<compile_context>
chip_gen: v6e
topology: v6e:2x2x1
jax: 0.10.0
libtpu: 0.0.40
codegen_flags: <defaults>
</compile_context>

<pallas_src>
import math

import jax
import jax.numpy as jnp
from jax.experimental import pallas as pl
from jax.experimental.pallas import tpu as pltpu

EPS = 1e-5  # nn.BatchNorm1d default eps


def _round_up(v, m):
    return (v + m - 1) // m * m


def _pad2(a, rows, cols):
    return jnp.pad(a, ((0, rows - a.shape[0]), (0, cols - a.shape[1])))


def gc_block_kernel(x_ref, m_ref,
                    w1_ref, a1_ref, b1_ref, g1_ref, be1_ref,
                    w2_ref, a2_ref, b2_ref, g2_ref, be2_ref,
                    o_ref):
    """All operands are in the lane-dense (Np, B*Fp) layout.

    x_ref   : (Np, BFp)   activations; node n on sublanes, (b, f) merged on lanes
    m_ref   : (BFp, BFp)  batch-averaging matrix: y @ M == per-(n,f) batch mean,
                          broadcast back over the batch lanes
    w*_ref  : (BFp, BFp)  block-diagonal feature weights  kron(I_B, W)
    a*_ref  : (Np, Np)    zero-padded learnable adjacency
    b*_ref  : (1, BFp)    GC bias, tiled over the batch lanes
    g*/be*  : (Np, BFp)   BatchNorm gamma/beta, tiled over the batch lanes
    """
    x = x_ref[...]
    M = m_ref[...]

    def graph_conv(inp, w, a, b):
        # One 2-D MXU matmul for the feature transform (block-diagonal W) ...
        support = jnp.dot(inp, w, preferred_element_type=jnp.float32)
        # ... and one 2-D MXU matmul for the adjacency aggregation.
        out = jnp.dot(a, support, preferred_element_type=jnp.float32)
        return out + b  # (1, BFp) row bias, broadcast over nodes

    def bn_relu(y, g, be):
        # Training-mode BatchNorm1d over the flattened (N*F) feature axis with
        # (biased) batch statistics.  The batch reduction + re-broadcast is a
        # single MXU matmul with M; the centered residual d is reused for both
        # the variance and the normalization.
        mu = jnp.dot(y, M, preferred_element_type=jnp.float32)
        d = y - mu
        var = jnp.dot(d * d, M, preferred_element_type=jnp.float32)
        y_hat = d * jax.lax.rsqrt(var + EPS)
        return jnp.maximum(y_hat * g + be, 0.0)

    y = graph_conv(x, w1_ref[...], a1_ref[...], b1_ref[...])
    y = bn_relu(y, g1_ref[...], be1_ref[...])
    # dropout(p=0.0) -> identity
    y = graph_conv(y, w2_ref[...], a2_ref[...], b2_ref[...])
    y = bn_relu(y, g2_ref[...], be2_ref[...])

    o_ref[...] = y + x


@jax.jit
def gc_block(x, params):
    """params = (W1, A1, b1, gamma1, beta1, W2, A2, b2, gamma2, beta2);
    gamma/beta are flat (N*F,) as in nn.BatchNorm1d(node_n * in_features)."""
    w1, a1, b1, g1, be1, w2, a2, b2, g2, be2 = params
    B, N, F = x.shape
    dtype = x.dtype

    # Pad nodes to a sublane multiple; pad features so B*Fp fills 128 lanes.
    Np = _round_up(N, 8)
    Fp = _round_up(F, 128 // math.gcd(B, 128))
    BFp = B * Fp

    # Activations: (B, N, F) -> zero-pad -> (Np, B, Fp) -> (Np, B*Fp).
    x_p = jnp.pad(x, ((0, 0), (0, Np - N), (0, Fp - F)))
    x_nbf = jnp.transpose(x_p, (1, 0, 2)).reshape(Np, BFp)

    # Constant batch-averaging matrix (mean over batch per (n, f), broadcast).
    M = jnp.tile(jnp.eye(Fp, dtype=dtype), (B, B)) / B

    eye_b = jnp.eye(B, dtype=dtype)

    def prep_layer(w, a, b, g, be):
        w_blk = jnp.kron(eye_b, _pad2(w, Fp, Fp))                    # (BFp, BFp)
        a_p = _pad2(a, Np, Np)                                       # (Np, Np)
        b_t = jnp.tile(jnp.pad(b, (0, Fp - F)), B)[None, :]          # (1, BFp)
        g_t = jnp.tile(_pad2(g.reshape(N, F), Np, Fp), (1, B))       # (Np, BFp)
        be_t = jnp.tile(_pad2(be.reshape(N, F), Np, Fp), (1, B))     # (Np, BFp)
        return w_blk, a_p, b_t, g_t, be_t

    layer1 = prep_layer(w1, a1, b1, g1, be1)
    layer2 = prep_layer(w2, a2, b2, g2, be2)

    vmem = pl.BlockSpec(memory_space=pltpu.MemorySpace.VMEM)
    out_nbf = pl.pallas_call(
        gc_block_kernel,
        out_shape=jax.ShapeDtypeStruct((Np, BFp), dtype),
        in_specs=[vmem] * 12,
        out_specs=vmem,
    )(x_nbf, M, *layer1, *layer2)

    # Back to (B, N, F), dropping the zero padding.
    out = jnp.transpose(out_nbf.reshape(Np, B, Fp), (1, 0, 2))
    return out[:, :N, :F]


@jax.jit
def gc_block_reference(x, params):
    """Pure-JAX reference mirroring the PyTorch forward (training-mode BN,
    dropout p=0)."""
    w1, a1, b1, g1, be1, w2, a2, b2, g2, be2 = params
    B, N, F = x.shape

    def gc(inp, w, a, b):
        return jnp.einsum("nm,bmf->bnf", a, inp @ w) + b

    def bn(y, g, be):
        yf = y.reshape(B, N * F)
        mu = jnp.mean(yf, axis=0, keepdims=True)
        var = jnp.mean((yf - mu) ** 2, axis=0, keepdims=True)
        out = (yf - mu) / jnp.sqrt(var + EPS) * g + be
        return out.reshape(B, N, F)

    y = jax.nn.relu(bn(gc(x, w1, a1, b1), g1, be1))
    y = jax.nn.relu(bn(gc(y, w2, a2, b2), g2, be2))
    return y + x


def init_params(key, node_n, in_features):
    """Deterministic init matching GraphConvolution.reset_parameters() /
    BatchNorm1d defaults (gamma=1, beta=0)."""
    stdv = 1.0 / math.sqrt(in_features)
    ks = jax.random.split(key, 6)

    def u(k, shape):
        return jax.random.uniform(k, shape, jnp.float32, minval=-stdv, maxval=stdv)

    w1 = u(ks[0], (in_features, in_features))
    a1 = u(ks[1], (node_n, node_n))
    b1 = u(ks[2], (in_features,))
    w2 = u(ks[3], (in_features, in_features))
    a2 = u(ks[4], (node_n, node_n))
    b2 = u(ks[5], (in_features,))

    gamma1 = jnp.ones((node_n * in_features,), jnp.float32)
    beta1 = jnp.zeros((node_n * in_features,), jnp.float32)
    gamma2 = jnp.ones((node_n * in_features,), jnp.float32)
    beta2 = jnp.zeros((node_n * in_features,), jnp.float32)

    return (w1, a1, b1, gamma1, beta1, w2, a2, b2, gamma2, beta2)


if __name__ == "__main__":
    B, node_n, in_features = 2, 57, 32  # node_n=57 is the module default

    key = jax.random.PRNGKey(0)
    kx, kp = jax.random.split(key)
    x = jax.random.normal(kx, (B, node_n, in_features), jnp.float32)
    params = init_params(kp, node_n, in_features)

    out = jax.block_until_ready(gc_block(x, params))
    ref = jax.block_until_ready(gc_block_reference(x, params))

    assert out.shape == (B, node_n, in_features)
    # BatchNorm with B=2 batch statistics amplifies f32 rounding by up to
    # rsqrt(eps) ~ 316x at near-degenerate (var ~ 0) elements, so allow a
    # slightly looser absolute tolerance than raw matmul error.
    assert jnp.allclose(out, ref, rtol=1e-4, atol=5e-4), "mismatch vs JAX reference"
    print("KERNEL_OK")
</pallas_src>

<mosaic_0001>
module attributes {stable_mosaic.version = 11 : i64} {
  func.func @gc_block_kernel(%arg0: memref<64x128xf32, #tpu.memory_space<vmem>>, %arg1: memref<128x128xf32, #tpu.memory_space<vmem>>, %arg2: memref<128x128xf32, #tpu.memory_space<vmem>>, %arg3: memref<64x64xf32, #tpu.memory_space<vmem>>, %arg4: memref<1x128xf32, #tpu.memory_space<vmem>>, %arg5: memref<64x128xf32, #tpu.memory_space<vmem>>, %arg6: memref<64x128xf32, #tpu.memory_space<vmem>>, %arg7: memref<128x128xf32, #tpu.memory_space<vmem>>, %arg8: memref<64x64xf32, #tpu.memory_space<vmem>>, %arg9: memref<1x128xf32, #tpu.memory_space<vmem>>, %arg10: memref<64x128xf32, #tpu.memory_space<vmem>>, %arg11: memref<64x128xf32, #tpu.memory_space<vmem>>, %arg12: memref<64x128xf32, #tpu.memory_space<vmem>>) attributes {dimension_semantics = [], scalar_prefetch = 0 : i64, scratch_operands = 0 : i64, tpu.core_type = #tpu.core_type<tc>} {
    %c0 = arith.constant 0 : index
    %c0_0 = arith.constant 0 : index
    %0 = vector.load %arg0[%c0, %c0_0] : memref<64x128xf32, #tpu.memory_space<vmem>>, vector<64x128xf32>
    %c0_1 = arith.constant 0 : index
    %c0_2 = arith.constant 0 : index
    %1 = vector.load %arg1[%c0_1, %c0_2] : memref<128x128xf32, #tpu.memory_space<vmem>>, vector<128x128xf32>
    %c0_3 = arith.constant 0 : index
    %c0_4 = arith.constant 0 : index
    %2 = vector.load %arg2[%c0_3, %c0_4] : memref<128x128xf32, #tpu.memory_space<vmem>>, vector<128x128xf32>
    %c0_5 = arith.constant 0 : index
    %c0_6 = arith.constant 0 : index
    %3 = vector.load %arg3[%c0_5, %c0_6] : memref<64x64xf32, #tpu.memory_space<vmem>>, vector<64x64xf32>
    %c0_7 = arith.constant 0 : index
    %c0_8 = arith.constant 0 : index
    %4 = vector.load %arg4[%c0_7, %c0_8] : memref<1x128xf32, #tpu.memory_space<vmem>>, vector<1x128xf32>
    %cst = arith.constant dense<0.000000e+00> : vector<64x128xf32>
    %5 = tpu.matmul %0, %2, %cst {dimension_numbers = #tpu.dot_dimension_numbers<[1], [0], [0], [1], [0, 0, 1, 1], [], []>} : vector<64x128xf32>, vector<128x128xf32>, vector<64x128xf32> -> vector<64x128xf32>
    %cst_9 = arith.constant dense<0.000000e+00> : vector<64x128xf32>
    %6 = tpu.matmul %3, %5, %cst_9 {dimension_numbers = #tpu.dot_dimension_numbers<[1], [0], [0], [1], [0, 0, 1, 1], [], []>} : vector<64x64xf32>, vector<64x128xf32>, vector<64x128xf32> -> vector<64x128xf32>
    %7 = vector.broadcast %4 : vector<1x128xf32> to vector<64x128xf32>
    %8 = arith.addf %6, %7 : vector<64x128xf32>
    %c0_10 = arith.constant 0 : index
    %c0_11 = arith.constant 0 : index
    %9 = vector.load %arg5[%c0_10, %c0_11] : memref<64x128xf32, #tpu.memory_space<vmem>>, vector<64x128xf32>
    %c0_12 = arith.constant 0 : index
    %c0_13 = arith.constant 0 : index
    %10 = vector.load %arg6[%c0_12, %c0_13] : memref<64x128xf32, #tpu.memory_space<vmem>>, vector<64x128xf32>
    %cst_14 = arith.constant dense<0.000000e+00> : vector<64x128xf32>
    %11 = tpu.matmul %8, %1, %cst_14 {dimension_numbers = #tpu.dot_dimension_numbers<[1], [0], [0], [1], [0, 0, 1, 1], [], []>} : vector<64x128xf32>, vector<128x128xf32>, vector<64x128xf32> -> vector<64x128xf32>
    %12 = arith.subf %8, %11 : vector<64x128xf32>
    %13 = arith.mulf %12, %12 : vector<64x128xf32>
    %cst_15 = arith.constant dense<0.000000e+00> : vector<64x128xf32>
    %14 = tpu.matmul %13, %1, %cst_15 {dimension_numbers = #tpu.dot_dimension_numbers<[1], [0], [0], [1], [0, 0, 1, 1], [], []>} : vector<64x128xf32>, vector<128x128xf32>, vector<64x128xf32> -> vector<64x128xf32>
    %cst_16 = arith.constant 9.99999974E-6 : f32
    %15 = vector.broadcast %cst_16 : f32 to vector<64x128xf32>
    %16 = arith.addf %14, %15 : vector<64x128xf32>
    %17 = math.rsqrt %16 : vector<64x128xf32>
    %18 = arith.mulf %12, %17 : vector<64x128xf32>
    %19 = arith.mulf %18, %9 : vector<64x128xf32>
    %20 = arith.addf %19, %10 : vector<64x128xf32>
    %cst_17 = arith.constant 0.000000e+00 : f32
    %21 = vector.broadcast %cst_17 : f32 to vector<64x128xf32>
    %22 = arith.maximumf %20, %21 : vector<64x128xf32>
    %c0_18 = arith.constant 0 : index
    %c0_19 = arith.constant 0 : index
    %23 = vector.load %arg7[%c0_18, %c0_19] : memref<128x128xf32, #tpu.memory_space<vmem>>, vector<128x128xf32>
    %c0_20 = arith.constant 0 : index
    %c0_21 = arith.constant 0 : index
    %24 = vector.load %arg8[%c0_20, %c0_21] : memref<64x64xf32, #tpu.memory_space<vmem>>, vector<64x64xf32>
    %c0_22 = arith.constant 0 : index
    %c0_23 = arith.constant 0 : index
    %25 = vector.load %arg9[%c0_22, %c0_23] : memref<1x128xf32, #tpu.memory_space<vmem>>, vector<1x128xf32>
    %cst_24 = arith.constant dense<0.000000e+00> : vector<64x128xf32>
    %26 = tpu.matmul %22, %23, %cst_24 {dimension_numbers = #tpu.dot_dimension_numbers<[1], [0], [0], [1], [0, 0, 1, 1], [], []>} : vector<64x128xf32>, vector<128x128xf32>, vector<64x128xf32> -> vector<64x128xf32>
    %cst_25 = arith.constant dense<0.000000e+00> : vector<64x128xf32>
    %27 = tpu.matmul %24, %26, %cst_25 {dimension_numbers = #tpu.dot_dimension_numbers<[1], [0], [0], [1], [0, 0, 1, 1], [], []>} : vector<64x64xf32>, vector<64x128xf32>, vector<64x128xf32> -> vector<64x128xf32>
    %28 = vector.broadcast %25 : vector<1x128xf32> to vector<64x128xf32>
    %29 = arith.addf %27, %28 : vector<64x128xf32>
    %c0_26 = arith.constant 0 : index
    %c0_27 = arith.constant 0 : index
    %30 = vector.load %arg10[%c0_26, %c0_27] : memref<64x128xf32, #tpu.memory_space<vmem>>, vector<64x128xf32>
    %c0_28 = arith.constant 0 : index
    %c0_29 = arith.constant 0 : index
    %31 = vector.load %arg11[%c0_28, %c0_29] : memref<64x128xf32, #tpu.memory_space<vmem>>, vector<64x128xf32>
    %cst_30 = arith.constant dense<0.000000e+00> : vector<64x128xf32>
    %32 = tpu.matmul %29, %1, %cst_30 {dimension_numbers = #tpu.dot_dimension_numbers<[1], [0], [0], [1], [0, 0, 1, 1], [], []>} : vector<64x128xf32>, vector<128x128xf32>, vector<64x128xf32> -> vector<64x128xf32>
    %33 = arith.subf %29, %32 : vector<64x128xf32>
    %34 = arith.mulf %33, %33 : vector<64x128xf32>
    %cst_31 = arith.constant dense<0.000000e+00> : vector<64x128xf32>
    %35 = tpu.matmul %34, %1, %cst_31 {dimension_numbers = #tpu.dot_dimension_numbers<[1], [0], [0], [1], [0, 0, 1, 1], [], []>} : vector<64x128xf32>, vector<128x128xf32>, vector<64x128xf32> -> vector<64x128xf32>
    %cst_32 = arith.constant 9.99999974E-6 : f32
    %36 = vector.broadcast %cst_32 : f32 to vector<64x128xf32>
    %37 = arith.addf %35, %36 : vector<64x128xf32>
    %38 = math.rsqrt %37 : vector<64x128xf32>
    %39 = arith.mulf %33, %38 : vector<64x128xf32>
    %40 = arith.mulf %39, %30 : vector<64x128xf32>
    %41 = arith.addf %40, %31 : vector<64x128xf32>
    %cst_33 = arith.constant 0.000000e+00 : f32
    %42 = vector.broadcast %cst_33 : f32 to vector<64x128xf32>
    %43 = arith.maximumf %41, %42 : vector<64x128xf32>
    %44 = arith.addf %43, %0 : vector<64x128xf32>
    %c0_34 = arith.constant 0 : index
    %c0_35 = arith.constant 0 : index
    %45 = vector.load %arg12[%c0_34, %c0_35] : memref<64x128xf32, #tpu.memory_space<vmem>>, vector<64x128xf32>
    tpu.vector_store %arg12[%c0_34, %c0_35], %44 {strides = array<i32>} : memref<64x128xf32, #tpu.memory_space<vmem>>, vector<64x128xf32>,
    return
  }
}

</mosaic_0001>

<bundles_post_ra>
// kernel: tile.49
= control target key start
LH: loop header
LB: loop body
LE: loop exit
PB: predicated region body
PF: predicated region fallthrough
CT: control target
= control target key end

     0   :  { %vm323_vm0 = vcmask 1047556   ;;  %s617_s10 = smov 64   ;;  %vm325_vm1 = vcmask 523264   ;;  %vm398_vm2 = vcmask 1048064   ;;  %s908_s0 = inlined_call_operand.vmem [shape: f32[64,2,64], index: 0, kind: input, shape index: {}]   ;;  %s909_s1 = inlined_call_operand.vmem [shape: f32[64,128], index: 1, kind: output, shape index: {}]  }
   0x1   :  { %v595_v0 = vld [vmem:[%s908_s0 + $0xe] sm:$0x3]  ;;  %v596_v1 = vld [vmem:[%s908_s0 + $0xc] sm:$0x3]  ;;  %v597_v2 = vld [vmem:[%s908_s0 + $0xa] sm:$0x3] }
   0x2   :  { %289 = vst [vmem:[#allocation0 + $0x38] sm:$0x3] %v595_v0  ;;  %294 = vst [vmem:[#allocation0 + $0x30] sm:$0x3] %v596_v1  ;;  %v598_v3 = vld [vmem:[%s908_s0 + $0x8] sm:$0x3] }
   0x3   :  { %299 = vst [vmem:[#allocation0 + $0x28] sm:$0x3] %v597_v2  ;;  %v599_v4 = vld [vmem:[%s908_s0 + $0x6] sm:$0x3]  ;;  %v600_v5 = vld [vmem:[%s908_s0 + $0x4] sm:$0x3] }
   0x4   :  { %304 = vst [vmem:[#allocation0 + $0x20] sm:$0x3] %v598_v3  ;;  %309 = vst [vmem:[#allocation0 + $0x18] sm:$0x3] %v599_v4  ;;  %v601_v6 = vld [vmem:[%s908_s0 + $0x2] sm:$0x3] }
   0x5   :  { %314 = vst [vmem:[#allocation0 + $0x10] sm:$0x3] %v600_v5  ;;  %v319_v7 = vld [vmem:[%s908_s0] sm:$0x3]  ;;  %318 = vst [vmem:[#allocation0 + $0x8] sm:$0x3] %v601_v6 }
   0x6   :  { %320 = vst [vmem:[#allocation0] sm:$0x3] %v319_v7  ;;  %v587_v8 = vld [vmem:[%s908_s0 + $0x1e] sm:$0x3]  ;;  %v588_v9 = vld [vmem:[%s908_s0 + $0x1c] sm:$0x3] }
   0x7   :  { %v589_v10 = vld [vmem:[%s908_s0 + $0x1a] sm:$0x3]  ;;  %249 = vst [vmem:[#allocation0 + $0x78] sm:$0x3] %v587_v8  ;;  %254 = vst [vmem:[#allocation0 + $0x70] sm:$0x3] %v588_v9 }
   0x8   :  { %259 = vst [vmem:[#allocation0 + $0x68] sm:$0x3] %v589_v10  ;;  %v590_v11 = vld [vmem:[%s908_s0 + $0x18] sm:$0x3]  ;;  %v591_v12 = vld [vmem:[%s908_s0 + $0x16] sm:$0x3] }
   0x9   :  { %v592_v13 = vld [vmem:[%s908_s0 + $0x14] sm:$0x3]  ;;  %264 = vst [vmem:[#allocation0 + $0x60] sm:$0x3] %v590_v11  ;;  %269 = vst [vmem:[#allocation0 + $0x58] sm:$0x3] %v591_v12 }
   0xa   :  { %274 = vst [vmem:[#allocation0 + $0x50] sm:$0x3] %v592_v13  ;;  %v593_v14 = vld [vmem:[%s908_s0 + $0x12] sm:$0x3]  ;;  %v594_v15 = vld [vmem:[%s908_s0 + $0x10] sm:$0x3] }
   0xb   :  { %v563_v16 = vld [vmem:[%s908_s0 + $0x4e] sm:$0x3]  ;;  %279 = vst [vmem:[#allocation0 + $0x48] sm:$0x3] %v593_v14  ;;  %284 = vst [vmem:[#allocation0 + $0x40] sm:$0x3] %v594_v15 }
   0xc   :  { %129 = vst [vmem:[#allocation0 + $0x138] sm:$0x3] %v563_v16  ;;  %v564_v17 = vld [vmem:[%s908_s0 + $0x4c] sm:$0x3]  ;;  %v565_v18 = vld [vmem:[%s908_s0 + $0x4a] sm:$0x3] }
   0xd   :  { %v566_v19 = vld [vmem:[%s908_s0 + $0x48] sm:$0x3]  ;;  %134 = vst [vmem:[#allocation0 + $0x130] sm:$0x3] %v564_v17  ;;  %139 = vst [vmem:[#allocation0 + $0x128] sm:$0x3] %v565_v18 }
   0xe   :  { %144 = vst [vmem:[#allocation0 + $0x120] sm:$0x3] %v566_v19  ;;  %v567_v20 = vld [vmem:[%s908_s0 + $0x46] sm:$0x3]  ;;  %v568_v21 = vld [vmem:[%s908_s0 + $0x44] sm:$0x3] }
   0xf   :  { %v569_v22 = vld [vmem:[%s908_s0 + $0x42] sm:$0x3]  ;;  %149 = vst [vmem:[#allocation0 + $0x118] sm:$0x3] %v567_v20  ;;  %154 = vst [vmem:[#allocation0 + $0x110] sm:$0x3] %v568_v21 }
  0x10   :  { %159 = vst [vmem:[#allocation0 + $0x108] sm:$0x3] %v569_v22  ;;  %v570_v23 = vld [vmem:[%s908_s0 + $0x40] sm:$0x3]  ;;  %v555_v24 = vld [vmem:[%s908_s0 + $0x5e] sm:$0x3] }
  0x11   :  { %v556_v25 = vld [vmem:[%s908_s0 + $0x5c] sm:$0x3]  ;;  %v393_v26 = vld [vmem:[#allocation0 + $0x1] ss:$8 sm:$0xf0]  }
  0x12   :  { %164 = vst [vmem:[#allocation0 + $0x100] sm:$0x3] %v570_v23  ;;  %89 = vst [vmem:[#allocation0 + $0x178] sm:$0x3] %v555_v24  ;;  %v557_v27 = vld [vmem:[%s908_s0 + $0x5a] sm:$0x3] }
  0x13   :  { %94 = vst [vmem:[#allocation0 + $0x170] sm:$0x3] %v556_v25  ;;  %v391_v28 = vld [vmem:[#allocation0 + $0x1] ss:$8 sm:$0xf]  }
  0x14   :  { %99 = vst [vmem:[#allocation0 + $0x168] sm:$0x3] %v557_v27  ;;  %v558_v29 = vld [vmem:[%s908_s0 + $0x58] sm:$0x3]  ;;  %v395_v30 = vsel %vm323_vm0, %v393_v26, %v391_v28  ;;  %v559_v31 = vld [vmem:[%s908_s0 + $0x56] sm:$0x3] }
  0x15   :  { %104 = vst [vmem:[#allocation0 + $0x160] sm:$0x3] %v558_v29  ;;  %v560_v32 = vld [vmem:[%s908_s0 + $0x54] sm:$0x3]  ;;  %v561_v33 = vld [vmem:[%s908_s0 + $0x52] sm:$0x3]  ;;  %396 = vrot.lane.b32.xlu0 %v395_v30, %s617_s10 }
  0x16   :  { %v414_v34 = vld [vmem:[#allocation0 + $0x41] ss:$8 sm:$0xf0]   ;;  %109 = vst [vmem:[#allocation0 + $0x158] sm:$0x3] %v559_v31 }
  0x17   :  { %114 = vst [vmem:[#allocation0 + $0x150] sm:$0x3] %v560_v32  ;;  %119 = vst [vmem:[#allocation0 + $0x148] sm:$0x3] %v561_v33  ;;  %v562_v35 = vld [vmem:[%s908_s0 + $0x50] sm:$0x3] }
  0x18   :  { %v412_v36 = vld [vmem:[#allocation0 + $0x41] ss:$8 sm:$0xf]   ;;  %124 = vst [vmem:[#allocation0 + $0x140] sm:$0x3] %v562_v35 }
  0x19   :  { %v579_v37 = vld [vmem:[%s908_s0 + $0x2e] sm:$0x3]  ;;  %v416_v38 = vsel %vm323_vm0, %v414_v34, %v412_v36  ;;  %v403_v39 = vld [vmem:[#allocation0 + $0x101] ss:$8 sm:$0xf0]  }
  0x1a   :  { %209 = vst [vmem:[#allocation0 + $0xb8] sm:$0x3] %v579_v37  ;;  %v580_v40 = vld [vmem:[%s908_s0 + $0x2c] sm:$0x3]  ;;  %417 = vrot.lane.b32.xlu1 %v416_v38, %s617_s10  ;;  %v581_v41 = vld [vmem:[%s908_s0 + $0x2a] sm:$0x3] }
  0x1b   :  { %214 = vst [vmem:[#allocation0 + $0xb0] sm:$0x3] %v580_v40  ;;  %v582_v42 = vld [vmem:[%s908_s0 + $0x28] sm:$0x3]  ;;  %v583_v43 = vld [vmem:[%s908_s0 + $0x26] sm:$0x3] }
  0x1c   :  { %v401_v44 = vld [vmem:[#allocation0 + $0x101] ss:$8 sm:$0xf]   ;;  %219 = vst [vmem:[#allocation0 + $0xa8] sm:$0x3] %v581_v41 }
  0x1d   :  { %224 = vst [vmem:[#allocation0 + $0xa0] sm:$0x3] %v582_v42  ;;  %229 = vst [vmem:[#allocation0 + $0x98] sm:$0x3] %v583_v43  ;;  %v584_v45 = vld [vmem:[%s908_s0 + $0x24] sm:$0x3]  ;;  %v405_v46 = vsel %vm323_vm0, %v403_v39, %v401_v44 }
  0x1e   :  { %234 = vst [vmem:[#allocation0 + $0x90] sm:$0x3] %v584_v45  ;;  %v585_v47 = vld [vmem:[%s908_s0 + $0x22] sm:$0x3]  ;;  %v586_v48 = vld [vmem:[%s908_s0 + $0x20] sm:$0x3]  ;;  %406 = vrot.lane.b32.xlu0 %v405_v46, %s617_s10 }
  0x1f   :  { %v547_v49 = vld [vmem:[%s908_s0 + $0x6e] sm:$0x3]  ;;  %v425_v50 = vld [vmem:[#allocation0 + $0x141] ss:$8 sm:$0xf0]  }
  0x20   :  { %239 = vst [vmem:[#allocation0 + $0x88] sm:$0x3] %v585_v47  ;;  %244 = vst [vmem:[#allocation0 + $0x80] sm:$0x3] %v586_v48  ;;  %v548_v51 = vld [vmem:[%s908_s0 + $0x6c] sm:$0x3] }
  0x21   :  { %49 = vst [vmem:[#allocation0 + $0x1b8] sm:$0x3] %v547_v49  ;;  %54 = vst [vmem:[#allocation0 + $0x1b0] sm:$0x3] %v548_v51  ;;  %v549_v52 = vld [vmem:[%s908_s0 + $0x6a] sm:$0x3] }
  0x22   :  { %v550_v53 = vld [vmem:[%s908_s0 + $0x68] sm:$0x3]  ;;  %v551_v54 = vld [vmem:[%s908_s0 + $0x66] sm:$0x3]  ;;  %59 = vst [vmem:[#allocation0 + $0x1a8] sm:$0x3] %v549_v52 }
  0x23   :  { %v423_v55 = vld [vmem:[#allocation0 + $0x141] ss:$8 sm:$0xf]   ;;  %64 = vst [vmem:[#allocation0 + $0x1a0] sm:$0x3] %v550_v53 }
  0x24   :  { %69 = vst [vmem:[#allocation0 + $0x198] sm:$0x3] %v551_v54  ;;  %v552_v56 = vld [vmem:[%s908_s0 + $0x64] sm:$0x3]  ;;  %v427_v57 = vsel %vm323_vm0, %v425_v50, %v423_v55  ;;  %v553_v58 = vld [vmem:[%s908_s0 + $0x62] sm:$0x3] }
  0x25   :  { %74 = vst [vmem:[#allocation0 + $0x190] sm:$0x3] %v552_v56  ;;  %v554_v59 = vld [vmem:[%s908_s0 + $0x60] sm:$0x3]  ;;  %v571_v60 = vld [vmem:[%s908_s0 + $0x3e] sm:$0x3]  ;;  %428 = vrot.lane.b32.xlu1 %v427_v57, %s617_s10 }
  0x26   :  { %79 = vst [vmem:[#allocation0 + $0x188] sm:$0x3] %v553_v58  ;;  %84 = vst [vmem:[#allocation0 + $0x180] sm:$0x3] %v554_v59  ;;  %v572_v61 = vld [vmem:[%s908_s0 + $0x3c] sm:$0x3] }
  0x27   :  { %169 = vst [vmem:[#allocation0 + $0xf8] sm:$0x3] %v571_v60  ;;  %v573_v62 = vld [vmem:[%s908_s0 + $0x3a] sm:$0x3]  ;;  %v574_v63 = vld [vmem:[%s908_s0 + $0x38] sm:$0x3] }
  0x28   :  { %v436_v0 = vld [vmem:[#allocation0 + $0x81] ss:$8 sm:$0xf0]   ;;  %174 = vst [vmem:[#allocation0 + $0xf0] sm:$0x3] %v572_v61 }
  0x29   :  { %179 = vst [vmem:[#allocation0 + $0xe8] sm:$0x3] %v573_v62  ;;  %184 = vst [vmem:[#allocation0 + $0xe0] sm:$0x3] %v574_v63  ;;  %v575_v1 = vld [vmem:[%s908_s0 + $0x36] sm:$0x3] }
  0x2a   :  { %189 = vst [vmem:[#allocation0 + $0xd8] sm:$0x3] %v575_v1  ;;  %v576_v2 = vld [vmem:[%s908_s0 + $0x34] sm:$0x3]  ;;  %v577_v3 = vld [vmem:[%s908_s0 + $0x32] sm:$0x3] }
  0x2b   :  { %v578_v4 = vld [vmem:[%s908_s0 + $0x30] sm:$0x3]  ;;  %194 = vst [vmem:[#allocation0 + $0xd0] sm:$0x3] %v576_v2  ;;  %199 = vst [vmem:[#allocation0 + $0xc8] sm:$0x3] %v577_v3 }
  0x2c   :  { %v434_v5 = vld [vmem:[#allocation0 + $0x81] ss:$8 sm:$0xf]   ;;  %204 = vst [vmem:[#allocation0 + $0xc0] sm:$0x3] %v578_v4 }
  0x2d   :  { %v539_v6 = vld [vmem:[%s908_s0 + $0x7e] sm:$0x3]  ;;  %v438_v7 = vsel %vm323_vm0, %v436_v0, %v434_v5  ;;  %v540_v8 = vld [vmem:[%s908_s0 + $0x7c] sm:$0x3]  ;;  %v541_v9 = vld [vmem:[%s908_s0 + $0x7a] sm:$0x3] }
  0x2e   :  { %9 = vst [vmem:[#allocation0 + $0x1f8] sm:$0x3] %v539_v6  ;;  %v542_v10 = vld [vmem:[%s908_s0 + $0x78] sm:$0x3]  ;;  %439 = vrot.lane.b32.xlu0 %v438_v7, %s617_s10  ;;  %14 = vst [vmem:[#allocation0 + $0x1f0] sm:$0x3] %v540_v8 }
  0x2f   :  { %v447_v11 = vld [vmem:[#allocation0 + $0x181] ss:$8 sm:$0xf0]   ;;  %19 = vst [vmem:[#allocation0 + $0x1e8] sm:$0x3] %v541_v9 }
  0x30   :  { %24 = vst [vmem:[#allocation0 + $0x1e0] sm:$0x3] %v542_v10  ;;  %v543_v12 = vld [vmem:[%s908_s0 + $0x76] sm:$0x3]  ;;  %v544_v13 = vld [vmem:[%s908_s0 + $0x74] sm:$0x3] }
  0x31   :  { %29 = vst [vmem:[#allocation0 + $0x1d8] sm:$0x3] %v543_v12  ;;  %v545_v14 = vld [vmem:[%s908_s0 + $0x72] sm:$0x3]  ;;  %v546_v15 = vld [vmem:[%s908_s0 + $0x70] sm:$0x3] }
  0x32   :  { %v445_v16 = vld [vmem:[#allocation0 + $0x181] ss:$8 sm:$0xf]   ;;  %34 = vst [vmem:[#allocation0 + $0x1d0] sm:$0x3] %v544_v13 }
  0x33   :  { %39 = vst [vmem:[#allocation0 + $0x1c8] sm:$0x3] %v545_v14  ;;  %44 = vst [vmem:[#allocation0 + $0x1c0] sm:$0x3] %v546_v15  ;;  %v449_v18 = vsel %vm323_vm0, %v447_v11, %v445_v16 }
  0x34   :  { %v321_v17 = vld [vmem:[#allocation0] ss:$8 sm:$0xf]   ;;  %v458_v19 = vld [vmem:[#allocation0 + $0xc1] ss:$8 sm:$0xf0]   ;;  %450 = vrot.lane.b32.xlu1 %v449_v18, %s617_s10 }
  0x35   :  { %v322_v20 = vld [vmem:[#allocation0] ss:$8 sm:$0xf0]   ;;  %v456_v24 = vld [vmem:[#allocation0 + $0xc1] ss:$8 sm:$0xf]  }
  0x36   :  { %v324_v21 = vsel %vm323_vm0, %v322_v20, %v321_v17  ;;  %v328_v22 = vld [vmem:[#allocation0 + $0x40] ss:$8 sm:$0xf]   ;;  %v460_v27 = vsel %vm323_vm0, %v458_v19, %v456_v24 }
  0x37   :  { %v330_v23 = vld [vmem:[#allocation0 + $0x40] ss:$8 sm:$0xf0]   ;;  %326 = vst.msk [vmem:[%s909_s1] sm:$0xff] %vm325_vm1, %v324_v21   ;;  %461 = vrot.lane.b32.xlu0 %v460_v27, %s617_s10 }
  0x38   :  { %v332_v25 = vsel %vm323_vm0, %v330_v23, %v328_v22  ;;  %v355_v26 = vld [vmem:[#allocation0 + $0x100] ss:$8 sm:$0xf]   ;;  %v469_v30 = vld [vmem:[#allocation0 + $0x1c1] ss:$8 sm:$0xf0]  }
  0x39   :  { %602 = vst.msk [vmem:[%s909_s1 + $0x8] sm:$0xff] %vm325_vm1, %v332_v25   ;;  %v357_v28 = vld [vmem:[#allocation0 + $0x100] ss:$8 sm:$0xf0]  }
  0x3a   :  { %v364_v29 = vld [vmem:[#allocation0 + $0x140] ss:$8 sm:$0xf]   ;;  %v359_v31 = vsel %vm323_vm0, %v357_v28, %v355_v26  ;;  %v467_v36 = vld [vmem:[#allocation0 + $0x1c1] ss:$8 sm:$0xf]  }
  0x3b   :  { %v366_v32 = vld [vmem:[#allocation0 + $0x140] ss:$8 sm:$0xf0]   ;;  %605 = vst.msk [vmem:[%s909_s1 + $0x20] sm:$0xff] %vm325_vm1, %v359_v31   ;;  %v471_v39 = vsel %vm323_vm0, %v469_v30, %v467_v36 }
  0x3c   :  { %v368_v33 = vsel %vm323_vm0, %v366_v32, %v364_v29  ;;  %v337_v34 = vld [vmem:[#allocation0 + $0x80] ss:$8 sm:$0xf]   ;;  %472 = vrot.lane.b32.xlu1 %v471_v39, %s617_s10 }
  0x3d   :  { %v339_v35 = vld [vmem:[#allocation0 + $0x80] ss:$8 sm:$0xf0]   ;;  %606 = vst.msk [vmem:[%s909_s1 + $0x28] sm:$0xff] %vm325_vm1, %v368_v33  }
  0x3e   :  { %v341_v37 = vsel %vm323_vm0, %v339_v35, %v337_v34  ;;  %v373_v38 = vld [vmem:[#allocation0 + $0x180] ss:$8 sm:$0xf]  }
  0x3f   :  { %603 = vst.msk [vmem:[%s909_s1 + $0x10] sm:$0xff] %vm325_vm1, %v341_v37   ;;  %v375_v40 = vld [vmem:[#allocation0 + $0x180] ss:$8 sm:$0xf0]  }
  0x40   :  { %v346_v41 = vld [vmem:[#allocation0 + $0xc0] ss:$8 sm:$0xf]   ;;  %v377_v42 = vsel %vm323_vm0, %v375_v40, %v373_v38 }
  0x41   :  { %v348_v43 = vld [vmem:[#allocation0 + $0xc0] ss:$8 sm:$0xf0]   ;;  %607 = vst.msk [vmem:[%s909_s1 + $0x30] sm:$0xff] %vm325_vm1, %v377_v42  }
  0x42   :  { %v382_v44 = vld [vmem:[#allocation0 + $0x1c0] ss:$8 sm:$0xf]   ;;  %v350_v45 = vsel %vm323_vm0, %v348_v43, %v346_v41 }
  0x43   :  { %v384_v46 = vld [vmem:[#allocation0 + $0x1c0] ss:$8 sm:$0xf0]   ;;  %604 = vst.msk [vmem:[%s909_s1 + $0x18] sm:$0xff] %vm325_vm1, %v350_v45  }
  0x44   :  { %v386_v47 = vsel %vm323_vm0, %v384_v46, %v382_v44 }
  0x45   :  { %608 = vst.msk [vmem:[%s909_s1 + $0x38] sm:$0xff] %vm325_vm1, %v386_v47  }
  0x87   :  { %v397_v48 = vpop.permute.xlu0 %396  }
  0x88   :  { %399 = vst.msk [vmem:[%s909_s1] sm:$0xff] %vm398_vm2, %v397_v48  }
  0x8c   :  { %v418_v49 = vpop.permute.xlu1 %417  }
  0x8d   :  { %610 = vst.msk [vmem:[%s909_s1 + $0x8] sm:$0xff] %vm398_vm2, %v418_v49  }
  0x90   :  { %v407_v50 = vpop.permute.xlu0 %406  }
  0x91   :  { %609 = vst.msk [vmem:[%s909_s1 + $0x20] sm:$0xff] %vm398_vm2, %v407_v50  }
  0x97   :  { %v429_v51 = vpop.permute.xlu1 %428  }
  0x98   :  { %611 = vst.msk [vmem:[%s909_s1 + $0x28] sm:$0xff] %vm398_vm2, %v429_v51  }
  0xa0   :  { %v440_v52 = vpop.permute.xlu0 %439  }
  0xa1   :  { %612 = vst.msk [vmem:[%s909_s1 + $0x10] sm:$0xff] %vm398_vm2, %v440_v52  }
  0xa6   :  { %v451_v53 = vpop.permute.xlu1 %450  }
  0xa7   :  { %613 = vst.msk [vmem:[%s909_s1 + $0x30] sm:$0xff] %vm398_vm2, %v451_v53  }
  0xa9   :  { %v462_v54 = vpop.permute.xlu0 %461  }
  0xaa   :  { %614 = vst.msk [vmem:[%s909_s1 + $0x18] sm:$0xff] %vm398_vm2, %v462_v54  }
  0xae   :  { %v473_v55 = vpop.permute.xlu1 %472  }
  0xaf   :  { %615 = vst.msk [vmem:[%s909_s1 + $0x38] sm:$0xff] %vm398_vm2, %v473_v55  }

// kernel: tile.43
= control target key start
LH: loop header
LB: loop body
LE: loop exit
PB: predicated region body
PF: predicated region fallthrough
CT: control target
= control target key end

     0   :  { %s22_s0 = inlined_call_operand.vmem [shape: f32[64], index: 0, kind: input, shape index: {}]   ;;  %s23_s1 = inlined_call_operand.vmem [shape: f32[2,64], index: 1, kind: output, shape index: {}]  }
   0x1   :  { %v4_v0 = vld [vmem:[%s22_s0] ss:$0 sm:$0xff] }
   0x2   :  { %5 = vst [vmem:[%s23_s1] sm:$0x3] %v4_v0 }

// kernel: tile.44
= control target key start
LH: loop header
LB: loop body
LE: loop exit
PB: predicated region body
PF: predicated region fallthrough
CT: control target
= control target key end

     0   :  { %vm8_vm0 = vcmask 523264   ;;  %vm14_vm1 = vcmask 1048064   ;;  %s42_s0 = inlined_call_operand.vmem [shape: f32[2,64], index: 0, kind: input, shape index: {}]   ;;  %s43_s1 = inlined_call_operand.vmem [shape: f32[1,128], index: 1, kind: output, shape index: {}]  }
   0x1   :  { %v5_v0 = vld [vmem:[%s42_s0] sm:$0x3]  ;;  %s25_s0 = smov 64  }
   0x2   :  { %6 = vst [vmem:[#allocation1] sm:$0x3] %v5_v0 }
   0x9   :  { %v11_v1 = vld [vmem:[#allocation1 + $0x1] sm:$0x1]   ;;  %v7_v2 = vld [vmem:[#allocation1] sm:$0x1]  }
   0xa   :  { %12 = vrot.lane.b32.xlu0 %v11_v1, %s25_s0  ;;  %9 = vst.msk [vmem:[#allocation0] sm:$0x1] %vm8_vm0, %v7_v2  }
  0x7c   :  { %v13_v3 = vpop.permute.xlu0 %12  }
  0x7d   :  { %15 = vst.msk [vmem:[#allocation0] sm:$0x1] %vm14_vm1, %v13_v3  }
  0x84   :  { %v20_v4 = vld [vmem:[#allocation0] sm:$0x1] }
  0x85   :  { %23 = vst [vmem:[%s43_s1] sm:$0x1] %v20_v4 }

// kernel: gc_block.1
= control target key start
LH: loop header
LB: loop body
LE: loop exit
PB: predicated region body
PF: predicated region fallthrough
CT: control target
= control target key end

     0   :  { %vm201_vm0 = vcmask 523264   ;;  %s2411_s2 = inlined_call_operand.vmem [shape: f32[128,128], index: 2, kind: input, shape index: {}]   ;;  %s2412_s0 = inlined_call_operand.vmem [shape: f32[64,128], index: 0, kind: input, shape index: {}]   ;;  %s2413_s3 = inlined_call_operand.vmem [shape: f32[64,64], index: 3, kind: input, shape index: {}]   ;;  %s2414_s1 = inlined_call_operand.vmem [shape: f32[128,128], index: 1, kind: input, shape index: {}]   ;;  %s2415_s4 = inlined_call_operand.vmem [shape: f32[1,128], index: 4, kind: input, shape index: {}]   ;;  %s2416_s7 = inlined_call_operand.vmem [shape: f32[128,128], index: 7, kind: input, shape index: {}]   ;;  %s2417_s5 = inlined_call_operand.vmem [shape: f32[64,128], index: 5, kind: input, shape index: {}]   ;;  %s2418_s6 = inlined_call_operand.vmem [shape: f32[64,128], index: 6, kind: input, shape index: {}]   ;;  %s2419_s8 = inlined_call_operand.vmem [shape: f32[64,64], index: 8, kind: input, shape index: {}]   ;;  %s2420_s9 = inlined_call_operand.vmem [shape: f32[1,128], index: 9, kind: input, shape index: {}]   ;;  %s2421_s10 = inlined_call_operand.vmem [shape: f32[64,128], index: 10, kind: input, shape index: {}]   ;;  %s2422_s11 = inlined_call_operand.vmem [shape: f32[64,128], index: 11, kind: input, shape index: {}]   ;;  %s2423_s12 = inlined_call_operand.vmem [shape: f32[64,128], index: 12, kind: output, shape index: {}]  }
   0x1   :  { %v80_v0 = vld [vmem:[%s2411_s2 + $0x78] sm:$0xff]  ;;  %v79_v1 = vld [vmem:[%s2411_s2 + $0x70] sm:$0xff]  ;;  %v78_v2 = vld [vmem:[%s2411_s2 + $0x68] sm:$0xff] }
   0x2   :  { %1374 = vmatprep.subr.mxu0 %v80_v0  ;;  %v77_v3 = vld [vmem:[%s2411_s2 + $0x60] sm:$0xff]  ;;  %v76_v5 = vld [vmem:[%s2411_s2 + $0x58] sm:$0xff]  ;;  %v75_v6 = vld [vmem:[%s2411_s2 + $0x50] sm:$0xff] }
   0x3   :  { %1375 = vmatpush3.msra.mxu0 %v80_v0  ;;  %v41_v4 = vld [vmem:[%s2412_s0] sm:$0xff]  ;;  %v74_v7 = vld [vmem:[%s2411_s2 + $0x48] sm:$0xff]  ;;  %v72_v9 = vld [vmem:[%s2411_s2 + $0x38] sm:$0xff] }
   0x4   :  { %1376 = vmatprep.subr.mxu0 %v79_v1  ;;  %1406 = vmatprep.mubr.f32.mxu0 %v41_v4  ;;  %v73_v8 = vld [vmem:[%s2411_s2 + $0x40] sm:$0xff]  ;;  %v71_v10 = vld [vmem:[%s2411_s2 + $0x30] sm:$0xff]  ;;  %v70_v11 = vld [vmem:[%s2411_s2 + $0x28] sm:$0xff] }
   0x5   :  { %1377 = vmatpush3.msra.mxu0 %v79_v1  ;;  %v69_v12 = vld [vmem:[%s2411_s2 + $0x20] sm:$0xff]  ;;  %v68_v13 = vld [vmem:[%s2411_s2 + $0x18] sm:$0xff]  ;;  %v67_v14 = vld [vmem:[%s2411_s2 + $0x10] sm:$0xff] }
   0x6   :  { %1378 = vmatprep.subr.mxu0 %v78_v2  ;;  %v66_v15 = vld [vmem:[%s2411_s2 + $0x8] sm:$0xff]  ;;  %v65_v16 = vld [vmem:[%s2411_s2] sm:$0xff]  ;;  %v43_v18 = vld [vmem:[%s2412_s0 + $0x10] sm:$0xff] }
   0x7   :  { %1379 = vmatpush3.msra.mxu0 %v78_v2  ;;  %v42_v17 = vld [vmem:[%s2412_s0 + $0x8] sm:$0xff]  ;;  %v44_v19 = vld [vmem:[%s2412_s0 + $0x18] sm:$0xff]  ;;  %v45_v20 = vld [vmem:[%s2412_s0 + $0x20] sm:$0xff] }
   0x8   :  { %1380 = vmatprep.subr.mxu0 %v77_v3  ;;  %v46_v21 = vld [vmem:[%s2412_s0 + $0x28] sm:$0xff]  ;;  %v47_v22 = vld [vmem:[%s2412_s0 + $0x30] sm:$0xff]  ;;  %v48_v23 = vld [vmem:[%s2412_s0 + $0x38] sm:$0xff] }
   0x9   :  { %1381 = vmatpush3.msra.mxu0 %v77_v3  ;;  %v81_v24 = vld [vmem:[%s2413_s3] sm:$0xff]  ;;  %v1878_v25 = vld [vmem:[%s2414_s1 + $0x78] sm:$0xff]  ;;  %v1884_v26 = vld [vmem:[%s2414_s1 + $0x70] sm:$0xff] }
   0xa   :  { %1382 = vmatprep.subr.mxu0 %v76_v5  ;;  %1434 = vmatprep.mubr.msk.f32.mxu1 %vm201_vm0, %v81_v24  ;;  %v1891_v27 = vld [vmem:[%s2414_s1 + $0x68] sm:$0xff]  ;;  %v1898_v28 = vld [vmem:[%s2414_s1 + $0x60] sm:$0xff]  ;;  %v1905_v29 = vld [vmem:[%s2414_s1 + $0x58] sm:$0xff] }
   0xb   :  { %1383 = vmatpush3.msra.mxu0 %v76_v5  ;;  %v1912_v30 = vld [vmem:[%s2414_s1 + $0x50] sm:$0xff]  ;;  %v1919_v31 = vld [vmem:[%s2414_s1 + $0x48] sm:$0xff]  ;;  %v1926_v32 = vld [vmem:[%s2414_s1 + $0x40] sm:$0xff] }
   0xc   :  { %1384 = vmatprep.subr.mxu0 %v75_v6  ;;  %v1933_v33 = vld [vmem:[%s2414_s1 + $0x38] sm:$0xff]  ;;  %v1940_v34 = vld [vmem:[%s2414_s1 + $0x30] sm:$0xff]  ;;  %v1947_v35 = vld [vmem:[%s2414_s1 + $0x28] sm:$0xff] }
   0xd   :  { %1385 = vmatpush3.msra.mxu0 %v75_v6  ;;  %v1954_v36 = vld [vmem:[%s2414_s1 + $0x20] sm:$0xff]  ;;  %v1961_v37 = vld [vmem:[%s2414_s1 + $0x18] sm:$0xff]  ;;  %v82_v46 = vld [vmem:[%s2413_s3 + $0x8] sm:$0xff] }
   0xe   :  { %1386 = vmatprep.subr.mxu0 %v74_v7  ;;  %v83_v47 = vld [vmem:[%s2413_s3 + $0x10] sm:$0xff]  ;;  %v84_v48 = vld [vmem:[%s2413_s3 + $0x18] sm:$0xff]  ;;  %v85_v49 = vld [vmem:[%s2413_s3 + $0x20] sm:$0xff] }
   0xf   :  { %1387 = vmatpush3.msra.mxu0 %v74_v7  ;;  %v86_v50 = vld [vmem:[%s2413_s3 + $0x28] sm:$0xff]  ;;  %v87_v51 = vld [vmem:[%s2413_s3 + $0x30] sm:$0xff]  ;;  %v88_v52 = vld [vmem:[%s2413_s3 + $0x38] sm:$0xff] }
  0x10   :  { %1388 = vmatprep.subr.mxu0 %v73_v8  ;;  %v2023_v53 = vld [vmem:[%s2414_s1 + $0x10] sm:$0xff]  ;;  %v2031_v54 = vld [vmem:[%s2414_s1 + $0x8] sm:$0xff]  ;;  %v2040_v55 = vld [vmem:[%s2414_s1] sm:$0xff] }
  0x11   :  { %1389 = vmatpush3.msra.mxu0 %v73_v8  ;;  %v1180_v57 = vld [vmem:[%s2415_s4] ss:$0 sm:$0xff] }
  0x12   :  { %1390 = vmatprep.subr.mxu0 %v72_v9 }
  0x13   :  { %1391 = vmatpush3.msra.mxu0 %v72_v9  ;;  %v628_v9 = vld [vmem:[%s2416_s7 + $0x78] sm:$0xff] }
  0x14   :  { %1392 = vmatprep.subr.mxu0 %v71_v10 }
  0x15   :  { %1393 = vmatpush3.msra.mxu0 %v71_v10  ;;  %v627_v10 = vld [vmem:[%s2416_s7 + $0x70] sm:$0xff] }
  0x16   :  { %1394 = vmatprep.subr.mxu0 %v70_v11 }
  0x17   :  { %1395 = vmatpush3.msra.mxu0 %v70_v11 }
  0x18   :  { %1396 = vmatprep.subr.mxu0 %v69_v12 }
  0x19   :  { %1397 = vmatpush3.msra.mxu0 %v69_v12 }
  0x1a   :  { %1398 = vmatprep.subr.mxu0 %v68_v13 }
  0x1b   :  { %1399 = vmatpush3.msra.mxu0 %v68_v13 }
  0x1c   :  { %1400 = vmatprep.subr.mxu0 %v67_v14 }
  0x1d   :  { %1401 = vmatpush3.msra.mxu0 %v67_v14 }
  0x1e   :  { %1402 = vmatprep.subr.mxu0 %v66_v15 }
  0x1f   :  { %1403 = vmatpush3.msra.mxu0 %v66_v15 }
  0x20   :  { %1404 = vmatprep.subr.mxu0 %v65_v16 }
  0x21   :  { %1405 = vmatpush3.msra.mxu0 %v65_v16 }
  0x22   :  { %1407 = vmatmul.mubr.f32.vlgmr.msra.gmra.mxu0 %v42_v17  ;;  %1490 = vmatprep.subr.mxu0 %v1878_v25 }
  0x23   :  { %1409 = vmatprep.mubr.f32.mxu0 %v43_v18  ;;  %1491 = vmatpush3.msra.mxu0 %v1878_v25 }
  0x24   :  { %1492 = vmatprep.subr.mxu0 %v1884_v26 }
  0x25   :  { %1493 = vmatpush3.msra.mxu0 %v1884_v26 }
  0x26   :  { %1410 = vmatmul.mubr.f32.gmra.mxu0 %v44_v19  ;;  %1494 = vmatprep.subr.mxu0 %v1891_v27 }
  0x27   :  { %1412 = vmatprep.mubr.f32.mxu0 %v45_v20  ;;  %1495 = vmatpush3.msra.mxu0 %v1891_v27 }
  0x28   :  { %1496 = vmatprep.subr.mxu0 %v1898_v28 }
  0x29   :  { %1497 = vmatpush3.msra.mxu0 %v1898_v28 }
  0x2a   :  { %1413 = vmatmul.mubr.f32.gmra.mxu0 %v46_v21  ;;  %1498 = vmatprep.subr.mxu0 %v1905_v29 }
  0x2b   :  { %1415 = vmatprep.mubr.f32.mxu0 %v47_v22  ;;  %1499 = vmatpush3.msra.mxu0 %v1905_v29 }
  0x2c   :  { %1500 = vmatprep.subr.mxu0 %v1912_v30 }
  0x2d   :  { %1501 = vmatpush3.msra.mxu0 %v1912_v30 }
  0x2e   :  { %1416 = vmatmul.mubr.f32.gmra.mxu0 %v48_v23  ;;  %1502 = vmatprep.subr.mxu0 %v1919_v31 }
  0x2f   :  { %1503 = vmatpush3.msra.mxu0 %v1919_v31 }
  0x30   :  { %1504 = vmatprep.subr.mxu0 %v1926_v32 }
  0x31   :  { %1505 = vmatpush3.msra.mxu0 %v1926_v32 }
  0x32   :  { %1506 = vmatprep.subr.mxu0 %v1933_v33 }
  0x33   :  { %1507 = vmatpush3.msra.mxu0 %v1933_v33 }
  0x34   :  { %1508 = vmatprep.subr.mxu0 %v1940_v34 }
  0x35   :  { %1509 = vmatpush3.msra.mxu0 %v1940_v34 }
  0x36   :  { %1510 = vmatprep.subr.mxu0 %v1947_v35 }
  0x37   :  { %1511 = vmatpush3.msra.mxu0 %v1947_v35 }
  0x38   :  { %1512 = vmatprep.subr.mxu0 %v1954_v36 }
  0x39   :  { %1513 = vmatpush3.msra.mxu0 %v1954_v36 }
  0x3a   :  { %1514 = vmatprep.subr.mxu0 %v1961_v37 }
  0x3b   :  { %1515 = vmatpush3.msra.mxu0 %v1961_v37 }
  0x3c   :  { %1516 = vmatprep.subr.mxu0 %v2023_v53 }
  0x3d   :  { %1517 = vmatpush3.msra.mxu0 %v2023_v53 }
  0x3e   :  { %1518 = vmatprep.subr.mxu0 %v2031_v54 }
  0x3f   :  { %1519 = vmatpush3.msra.mxu0 %v2031_v54 }
  0x40   :  { %1520 = vmatprep.subr.mxu0 %v2040_v55 }
  0x41   :  { %1521 = vmatpush3.msra.mxu0 %v2040_v55 }
  0xe2   :  { %v1408_v38 = vpop.f32.mrf.mxu0 }
  0xe4   :  { %v156_v39 = vpop.f32.mrf.mxu0 }
  0xe6   :  { %v1411_v40 = vpop.f32.mrf.mxu0 }
  0xe8   :  { %v166_v41 = vpop.f32.mrf.mxu0 }
  0xea   :  { %v1414_v42 = vpop.f32.mrf.mxu0 }
  0xec   :  { %v176_v43 = vpop.f32.mrf.mxu0 }
  0xee   :  { %v1417_v44 = vpop.f32.mrf.mxu0 }
  0xef   :  { %1418 = vmatprep.subr.mxu1 %v1417_v44 }
  0xf0   :  { %v186_v45 = vpop.f32.mrf.mxu0  ;;  %1419 = vmatpush3.msra.mxu1 %v1417_v44 }
  0xf1   :  { %1420 = vmatprep.subr.mxu1 %v186_v45 }
  0xf2   :  { %1421 = vmatpush3.msra.mxu1 %v186_v45 }
  0xf3   :  { %1422 = vmatprep.subr.mxu1 %v1414_v42 }
  0xf4   :  { %1423 = vmatpush3.msra.mxu1 %v1414_v42 }
  0xf5   :  { %1424 = vmatprep.subr.mxu1 %v176_v43 }
  0xf6   :  { %1425 = vmatpush3.msra.mxu1 %v176_v43 }
  0xf7   :  { %1426 = vmatprep.subr.mxu1 %v1411_v40 }
  0xf8   :  { %1427 = vmatpush3.msra.mxu1 %v1411_v40 }
  0xf9   :  { %1428 = vmatprep.subr.mxu1 %v166_v41 }
  0xfa   :  { %1429 = vmatpush3.msra.mxu1 %v166_v41 }
  0xfb   :  { %1430 = vmatprep.subr.mxu1 %v1408_v38 }
  0xfc   :  { %1431 = vmatpush3.msra.mxu1 %v1408_v38 }
  0xfd   :  { %1432 = vmatprep.subr.mxu1 %v156_v39 }
  0xfe   :  { %1433 = vmatpush3.msra.mxu1 %v156_v39 }
  0xff   :  { %1435 = vmatmul.mubr.msk.f32.vlgmr.msra.gmra.mxu1 %vm201_vm0, %v82_v46  ;;  %1446 = vmatprep.subr.mxu1 %v1878_v25 }
 0x100   :  { %1437 = vmatprep.mubr.msk.f32.mxu1 %vm201_vm0, %v83_v47  ;;  %1447 = vmatpush3.msra.mxu1 %v1878_v25 }
 0x101   :  { %1448 = vmatprep.subr.mxu1 %v1884_v26 }
 0x102   :  { %1449 = vmatpush3.msra.mxu1 %v1884_v26 }
 0x103   :  { %1438 = vmatmul.mubr.msk.f32.gmra.mxu1 %vm201_vm0, %v84_v48  ;;  %1450 = vmatprep.subr.mxu1 %v1891_v27  ;;  %v626_v48 = vld [vmem:[%s2416_s7 + $0x68] sm:$0xff] }
 0x104   :  { %1440 = vmatprep.mubr.msk.f32.mxu1 %vm201_vm0, %v85_v49  ;;  %1451 = vmatpush3.msra.mxu1 %v1891_v27  ;;  %v625_v49 = vld [vmem:[%s2416_s7 + $0x60] sm:$0xff] }
 0x105   :  { %1452 = vmatprep.subr.mxu1 %v1898_v28 }
 0x106   :  { %1453 = vmatpush3.msra.mxu1 %v1898_v28 }
 0x107   :  { %1441 = vmatmul.mubr.msk.f32.gmra.mxu1 %vm201_vm0, %v86_v50  ;;  %1454 = vmatprep.subr.mxu1 %v1905_v29  ;;  %v624_v50 = vld [vmem:[%s2416_s7 + $0x58] sm:$0xff] }
 0x108   :  { %1443 = vmatprep.mubr.msk.f32.mxu1 %vm201_vm0, %v87_v51  ;;  %1455 = vmatpush3.msra.mxu1 %v1905_v29  ;;  %v623_v51 = vld [vmem:[%s2416_s7 + $0x50] sm:$0xff] }
 0x109   :  { %1456 = vmatprep.subr.mxu1 %v1912_v30 }
 0x10a   :  { %1457 = vmatpush3.msra.mxu1 %v1912_v30 }
 0x10b   :  { %1444 = vmatmul.mubr.msk.f32.gmra.mxu1 %vm201_vm0, %v88_v52  ;;  %1458 = vmatprep.subr.mxu1 %v1919_v31  ;;  %v622_v52 = vld [vmem:[%s2416_s7 + $0x48] sm:$0xff] }
 0x10c   :  { %1459 = vmatpush3.msra.mxu1 %v1919_v31 }
 0x10d   :  { %1460 = vmatprep.subr.mxu1 %v1926_v32 }
 0x10e   :  { %1461 = vmatpush3.msra.mxu1 %v1926_v32 }
 0x10f   :  { %1462 = vmatprep.subr.mxu1 %v1933_v33 }
 0x110   :  { %1463 = vmatpush3.msra.mxu1 %v1933_v33 }
 0x111   :  { %1464 = vmatprep.subr.mxu1 %v1940_v34 }
 0x112   :  { %1465 = vmatpush3.msra.mxu1 %v1940_v34 }
 0x113   :  { %1466 = vmatprep.subr.mxu1 %v1947_v35 }
 0x114   :  { %1467 = vmatpush3.msra.mxu1 %v1947_v35 }
 0x115   :  { %1468 = vmatprep.subr.mxu1 %v1954_v36 }
 0x116   :  { %1469 = vmatpush3.msra.mxu1 %v1954_v36 }
 0x117   :  { %1470 = vmatprep.subr.mxu1 %v1961_v37 }
 0x118   :  { %1471 = vmatpush3.msra.mxu1 %v1961_v37 }
 0x119   :  { %1472 = vmatprep.subr.mxu1 %v2023_v53 }
 0x11a   :  { %1473 = vmatpush3.msra.mxu1 %v2023_v53 }
 0x11b   :  { %1474 = vmatprep.subr.mxu1 %v2031_v54 }
 0x11c   :  { %1475 = vmatpush3.msra.mxu1 %v2031_v54 }
 0x11d   :  { %1476 = vmatprep.subr.mxu1 %v2040_v55 }
 0x11e   :  { %1477 = vmatpush3.msra.mxu1 %v2040_v55 }
 0x11f   :  { %1534 = vmatprep.subr.mxu1 %v628_v9 }
 0x1bf   :  { %v1436_v56 = vpop.f32.mrf.mxu1 }
 0x1c0   :  { %v298_v60 = vadd.f32 %v1436_v56, %v1180_v57  ;;  %v621_v56 = vld [vmem:[%s2416_s7 + $0x40] sm:$0xff] }
 0x1c1   :  { %v292_v58 = vpop.f32.mrf.mxu1 }
 0x1c2   :  { %v293_v59 = vadd.f32 %v1180_v57, %v292_v58  ;;  %v619_v58 = vld [vmem:[%s2416_s7 + $0x30] sm:$0xff] }
 0x1c3   :  { %v1439_v61 = vpop.f32.mrf.mxu1 }
 0x1c4   :  { %1478 = vmatprep.mubr.f32.mxu1 %v293_v59  ;;  %v308_v0 = vadd.f32 %v1439_v61, %v1180_v57  ;;  %v616_v61 = vld [vmem:[%s2416_s7 + $0x18] sm:$0xff] }
 0x1c5   :  { %v302_v62 = vpop.f32.mrf.mxu1  ;;  %1479 = vmatmul.mubr.f32.vlgmr.msra.gmra.mxu1 %v298_v60 }
 0x1c6   :  { %v303_v63 = vadd.f32 %v1180_v57, %v302_v62  ;;  %1535 = vmatpush3.msra.mxu1 %v628_v9  ;;  %v615_v62 = vld [vmem:[%s2416_s7 + $0x10] sm:$0xff] }
 0x1c7   :  { %v1442_v1 = vpop.f32.mrf.mxu1  ;;  %1536 = vmatprep.subr.mxu1 %v627_v10 }
 0x1c8   :  { %1481 = vmatprep.mubr.f32.mxu1 %v303_v63  ;;  %v318_v4 = vadd.f32 %v1442_v1, %v1180_v57  ;;  %1537 = vmatpush3.msra.mxu1 %v627_v10 }
 0x1c9   :  { %v312_v2 = vpop.f32.mrf.mxu1  ;;  %1482 = vmatmul.mubr.f32.gmra.mxu1 %v308_v0  ;;  %1538 = vmatprep.subr.mxu1 %v626_v48 }
 0x1ca   :  { %v313_v3 = vadd.f32 %v1180_v57, %v312_v2  ;;  %1539 = vmatpush3.msra.mxu1 %v626_v48 }
 0x1cb   :  { %v1445_v5 = vpop.f32.mrf.mxu1  ;;  %1540 = vmatprep.subr.mxu1 %v625_v49 }
 0x1cc   :  { %1484 = vmatprep.mubr.f32.mxu1 %v313_v3  ;;  %v328_v8 = vadd.f32 %v1445_v5, %v1180_v57  ;;  %1541 = vmatpush3.msra.mxu1 %v625_v49 }
 0x1cd   :  { %v322_v6 = vpop.f32.mrf.mxu1  ;;  %1485 = vmatmul.mubr.f32.gmra.mxu1 %v318_v4  ;;  %1542 = vmatprep.subr.mxu1 %v624_v50 }
 0x1ce   :  { %v323_v7 = vadd.f32 %v1180_v57, %v322_v6  ;;  %1543 = vmatpush3.msra.mxu1 %v624_v50  ;;  %v620_v57 = vld [vmem:[%s2416_s7 + $0x38] sm:$0xff] }
 0x1cf   :  { %1544 = vmatprep.subr.mxu1 %v623_v51 }
 0x1d0   :  { %1487 = vmatprep.mubr.f32.mxu1 %v323_v7  ;;  %1545 = vmatpush3.msra.mxu1 %v623_v51 }
 0x1d1   :  { %1488 = vmatmul.mubr.f32.gmra.mxu1 %v328_v8  ;;  %1546 = vmatprep.subr.mxu1 %v622_v52 }
 0x1d2   :  { %1547 = vmatpush3.msra.mxu1 %v622_v52 }
 0x1d3   :  { %1548 = vmatprep.subr.mxu1 %v621_v56 }
 0x1d4   :  { %1549 = vmatpush3.msra.mxu1 %v621_v56 }
 0x1d5   :  { %1550 = vmatprep.subr.mxu1 %v620_v57 }
 0x1d6   :  { %1551 = vmatpush3.msra.mxu1 %v620_v57  ;;  %v342_v57 = vld [vmem:[%s2418_s6 + $0x18] sm:$0xff] }
 0x1d7   :  { %1552 = vmatprep.subr.mxu1 %v619_v58 }
 0x1d8   :  { %1553 = vmatpush3.msra.mxu1 %v619_v58 }
 0x285   :  { %v1480_v11 = vpop.f32.mrf.mxu1 }
 0x286   :  { %v2056_v12 = vsub.f32 %v298_v60, %v1480_v11  ;;  %v617_v60 = vld [vmem:[%s2416_s7 + $0x20] sm:$0xff] }
 0x287   :  { %v413_v13 = vpop.f32.mrf.mxu1 }
 0x288   :  { %v2058_v14 = vsub.f32 %v293_v59, %v413_v13  ;;  %v461_v17 = vmul.f32 %v2056_v12, %v2056_v12  ;;  %v618_v59 = vld [vmem:[%s2416_s7 + $0x28] sm:$0xff] }
 0x289   :  { %v1483_v15 = vpop.f32.mrf.mxu1  ;;  %1554 = vmatprep.subr.mxu1 %v618_v59 }
 0x28a   :  { %v460_v16 = vmul.f32 %v2058_v14, %v2058_v14  ;;  %v2064_v18 = vsub.f32 %v308_v0, %v1483_v15  ;;  %1555 = vmatpush3.msra.mxu1 %v618_v59  ;;  %v613_v0 = vld [vmem:[%s2416_s7] sm:$0xff] }
 0x28b   :  { %v423_v19 = vpop.f32.mrf.mxu1  ;;  %1556 = vmatprep.subr.mxu1 %v617_v60 }
 0x28c   :  { %v2066_v20 = vsub.f32 %v303_v63, %v423_v19  ;;  %1522 = vmatprep.mubr.f32.mxu0 %v460_v16  ;;  %v463_v23 = vmul.f32 %v2064_v18, %v2064_v18  ;;  %1557 = vmatpush3.msra.mxu1 %v617_v60  ;;  %v614_v63 = vld [vmem:[%s2416_s7 + $0x8] sm:$0xff]  ;;  %v341_v60 = vld [vmem:[%s2418_s6 + $0x10] sm:$0xff] }
 0x28d   :  { %v1486_v21 = vpop.f32.mrf.mxu1  ;;  %1523 = vmatmul.mubr.f32.vlgmr.msra.gmra.mxu0 %v461_v17  ;;  %1558 = vmatprep.subr.mxu1 %v616_v61 }
 0x28e   :  { %v462_v22 = vmul.f32 %v2066_v20, %v2066_v20  ;;  %v2072_v24 = vsub.f32 %v318_v4, %v1486_v21  ;;  %1559 = vmatpush3.msra.mxu1 %v616_v61 }
 0x28f   :  { %v433_v38 = vpop.f32.mrf.mxu1  ;;  %1560 = vmatprep.subr.mxu1 %v615_v62 }
 0x290   :  { %v2074_v39 = vsub.f32 %v313_v3, %v433_v38  ;;  %1525 = vmatprep.mubr.f32.mxu0 %v462_v22  ;;  %v465_v42 = vmul.f32 %v2072_v24, %v2072_v24  ;;  %1561 = vmatpush3.msra.mxu1 %v615_v62  ;;  %v332_v22 = vld [vmem:[%s2417_s5 + $0x8] sm:$0xff] }
 0x291   :  { %v1489_v40 = vpop.f32.mrf.mxu1  ;;  %1526 = vmatmul.mubr.f32.gmra.mxu0 %v463_v23  ;;  %1562 = vmatprep.subr.mxu1 %v614_v63 }
 0x292   :  { %v464_v41 = vmul.f32 %v2074_v39, %v2074_v39  ;;  %v2080_v43 = vsub.f32 %v328_v8, %v1489_v40  ;;  %1563 = vmatpush3.msra.mxu1 %v614_v63  ;;  %v331_v40 = vld [vmem:[%s2417_s5] sm:$0xff] }
 0x293   :  { %v443_v44 = vpop.f32.mrf.mxu1  ;;  %1564 = vmatprep.subr.mxu1 %v613_v0 }
 0x294   :  { %v2082_v45 = vsub.f32 %v323_v7, %v443_v44  ;;  %1528 = vmatprep.mubr.f32.mxu0 %v464_v41  ;;  %v467_v47 = vmul.f32 %v2080_v43, %v2080_v43  ;;  %1565 = vmatpush3.msra.mxu1 %v613_v0 }
 0x295   :  { %1529 = vmatmul.mubr.f32.gmra.mxu0 %v465_v42  ;;  %1650 = vmatprep.subr.mxu1 %v1878_v25  ;;  %v340_v42 = vld [vmem:[%s2418_s6 + $0x8] sm:$0xff] }
 0x296   :  { %v466_v46 = vmul.f32 %v2082_v45, %v2082_v45 }
 0x298   :  { %1531 = vmatprep.mubr.f32.mxu0 %v466_v46 }
 0x299   :  { %1532 = vmatmul.mubr.f32.gmra.mxu0 %v467_v47  ;;  %v339_v47 = vld [vmem:[%s2418_s6] sm:$0xff] }
 0x34d   :  { %v1524_v1 = vpop.f32.mrf.mxu0 }
 0x34e   :  { %v540_v2 = vadd.f32 1e-05, %v1524_v1 }
 0x34f   :  { %v534_v3 = vpop.f32.mrf.mxu0 }
 0x350   :  { %1694 = vrsqrt.f32 %v540_v2  ;;  %v535_v4 = vadd.f32 1e-05, %v534_v3  ;;  %v335_v2 = vld [vmem:[%s2417_s5 + $0x20] sm:$0xff] }
 0x351   :  { %v1527_v5 = vpop.f32.mrf.mxu0 }
 0x352   :  { %1696 = vrsqrt.f32 %v535_v4  ;;  %v550_v6 = vadd.f32 1e-05, %v1527_v5  ;;  %v344_v5 = vld [vmem:[%s2418_s6 + $0x28] sm:$0xff] }
 0x353   :  { %v544_v7 = vpop.f32.mrf.mxu0 }
 0x354   :  { %1698 = vrsqrt.f32 %v550_v6  ;;  %v545_v8 = vadd.f32 1e-05, %v544_v7 }
 0x355   :  { %v1530_v9 = vpop.f32.mrf.mxu0 }
 0x356   :  { %1700 = vrsqrt.f32 %v545_v8  ;;  %v560_v10 = vadd.f32 1e-05, %v1530_v9  ;;  %v338_v8 = vld [vmem:[%s2417_s5 + $0x38] sm:$0xff] }
 0x357   :  { %v554_v11 = vpop.f32.mrf.mxu0 }
 0x358   :  { %1702 = vrsqrt.f32 %v560_v10  ;;  %v555_v13 = vadd.f32 1e-05, %v554_v11 }
 0x359   :  { %v1533_v15 = vpop.f32.mrf.mxu0 }
 0x35a   :  { %1704 = vrsqrt.f32 %v555_v13  ;;  %v570_v16 = vadd.f32 1e-05, %v1533_v15 }
 0x35b   :  { %v564_v17 = vpop.f32.mrf.mxu0 }
 0x35c   :  { %1706 = vrsqrt.f32 %v570_v16  ;;  %v565_v19 = vadd.f32 1e-05, %v564_v17  ;;  %v337_v16 = vld [vmem:[%s2417_s5 + $0x30] sm:$0xff] }
 0x35d   :  { %v1695_v21 = vpop.eup %1694 }
 0x35e   :  { %v582_v23 = vmul.f32 %v1695_v21, %v2056_v12  ;;  %1708 = vrsqrt.f32 %v565_v19  ;;  %v334_v12 = vld [vmem:[%s2417_s5 + $0x18] sm:$0xff] }
 0x35f   :  { %v1697_v38 = vpop.eup %1696  ;;  %v346_v21 = vld [vmem:[%s2418_s6 + $0x38] sm:$0xff] }
 0x360   :  { %v581_v41 = vmul.f32 %v1697_v38, %v2058_v14  ;;  %v590_v44 = vmul.f32 %v582_v23, %v332_v22  ;;  %v333_v14 = vld [vmem:[%s2417_s5 + $0x10] sm:$0xff] }
 0x361   :  { %v1699_v46 = vpop.eup %1698  ;;  %v345_v22 = vld [vmem:[%s2418_s6 + $0x30] sm:$0xff] }
 0x362   :  { %v589_v48 = vmul.f32 %v581_v41, %v331_v40  ;;  %v584_v49 = vmul.f32 %v1699_v46, %v2064_v18  ;;  %v598_v51 = vadd.f32 %v590_v44, %v340_v42  ;;  %v336_v18 = vld [vmem:[%s2417_s5 + $0x28] sm:$0xff]  ;;  %v629_v46 = vld [vmem:[%s2419_s8] sm:$0xff] }
 0x363   :  { %v1701_v50 = vpop.eup %1700  ;;  %1594 = vmatprep.mubr.msk.f32.mxu0 %vm201_vm0, %v629_v46 }
 0x364   :  { %v597_v52 = vadd.f32 %v589_v48, %v339_v47  ;;  %v583_v56 = vmul.f32 %v1701_v50, %v2066_v20  ;;  %v592_v58 = vmul.f32 %v584_v49, %v334_v12  ;;  %v606_v20 = vmax.f32 %v598_v51, 0.0 }
 0x365   :  { %v1703_v59 = vpop.eup %1702 }
 0x366   :  { %v605_v61 = vmax.f32 %v597_v52, 0.0  ;;  %v591_v62 = vmul.f32 %v583_v56, %v333_v14  ;;  %v586_v63 = vmul.f32 %v1703_v59, %v2072_v24  ;;  %v600_v1 = vadd.f32 %v592_v58, %v342_v57  ;;  %v343_v24 = vld [vmem:[%s2418_s6 + $0x20] sm:$0xff]  ;;  %v630_v56 = vld [vmem:[%s2419_s8 + $0x8] sm:$0xff]  ;;  %v631_v57 = vld [vmem:[%s2419_s8 + $0x10] sm:$0xff] }
 0x367   :  { %v1705_v0 = vpop.eup %1704  ;;  %v632_v58 = vld [vmem:[%s2419_s8 + $0x18] sm:$0xff]  ;;  %v633_v59 = vld [vmem:[%s2419_s8 + $0x20] sm:$0xff] }
 0x368   :  { %1566 = vmatprep.mubr.f32.mxu1 %v605_v61  ;;  %v599_v3 = vadd.f32 %v591_v62, %v341_v60  ;;  %v585_v4 = vmul.f32 %v1705_v0, %v2074_v39  ;;  %v594_v6 = vmul.f32 %v586_v63, %v336_v18  ;;  %v608_v13 = vmax.f32 %v600_v1, 0.0  ;;  %v634_v60 = vld [vmem:[%s2419_s8 + $0x28] sm:$0xff] }
 0x369   :  { %v1707_v7 = vpop.eup %1706  ;;  %1567 = vmatmul.mubr.f32.vlgmr.msra.gmra.mxu1 %v606_v20 }
 0x36a   :  { %v607_v9 = vmax.f32 %v599_v3, 0.0  ;;  %v593_v10 = vmul.f32 %v585_v4, %v335_v2  ;;  %v588_v11 = vmul.f32 %v1707_v7, %v2080_v43  ;;  %1651 = vmatpush3.msra.mxu1 %v1878_v25  ;;  %v602_v15 = vadd.f32 %v594_v6, %v344_v5 }
 0x36b   :  { %v1709_v39 = vpop.eup %1708  ;;  %1652 = vmatprep.subr.mxu1 %v1884_v26 }
 0x36c   :  { %1569 = vmatprep.mubr.f32.mxu1 %v607_v9  ;;  %v601_v17 = vadd.f32 %v593_v10, %v343_v24  ;;  %v587_v19 = vmul.f32 %v1709_v39, %v2082_v45  ;;  %v596_v43 = vmul.f32 %v588_v11, %v338_v8  ;;  %1653 = vmatpush3.msra.mxu1 %v1884_v26  ;;  %v610_v40 = vmax.f32 %v602_v15, 0.0 }
 0x36d   :  { %1570 = vmatmul.mubr.f32.gmra.mxu1 %v608_v13  ;;  %1654 = vmatprep.subr.mxu1 %v1891_v27 }
 0x36e   :  { %v609_v23 = vmax.f32 %v601_v17, 0.0  ;;  %v595_v38 = vmul.f32 %v587_v19, %v337_v16  ;;  %1655 = vmatpush3.msra.mxu1 %v1891_v27  ;;  %v604_v45 = vadd.f32 %v596_v43, %v346_v21 }
 0x36f   :  { %1656 = vmatprep.subr.mxu1 %v1898_v28 }
 0x370   :  { %1572 = vmatprep.mubr.f32.mxu1 %v609_v23  ;;  %v603_v41 = vadd.f32 %v595_v38, %v345_v22  ;;  %1657 = vmatpush3.msra.mxu1 %v1898_v28  ;;  %v612_v44 = vmax.f32 %v604_v45, 0.0 }
 0x371   :  { %1573 = vmatmul.mubr.f32.gmra.mxu1 %v610_v40  ;;  %1658 = vmatprep.subr.mxu1 %v1905_v29 }
 0x372   :  { %v611_v42 = vmax.f32 %v603_v41, 0.0  ;;  %1659 = vmatpush3.msra.mxu1 %v1905_v29 }
 0x373   :  { %1660 = vmatprep.subr.mxu1 %v1912_v30 }
 0x374   :  { %1575 = vmatprep.mubr.f32.mxu1 %v611_v42  ;;  %1661 = vmatpush3.msra.mxu1 %v1912_v30 }
 0x375   :  { %1576 = vmatmul.mubr.f32.gmra.mxu1 %v612_v44  ;;  %1662 = vmatprep.subr.mxu1 %v1919_v31 }
 0x376   :  { %1663 = vmatpush3.msra.mxu1 %v1919_v31 }
 0x377   :  { %1664 = vmatprep.subr.mxu1 %v1926_v32 }
 0x378   :  { %1665 = vmatpush3.msra.mxu1 %v1926_v32 }
 0x379   :  { %1666 = vmatprep.subr.mxu1 %v1933_v33 }
 0x37a   :  { %1667 = vmatpush3.msra.mxu1 %v1933_v33 }
 0x37b   :  { %1668 = vmatprep.subr.mxu1 %v1940_v34 }
 0x37c   :  { %1669 = vmatpush3.msra.mxu1 %v1940_v34 }
 0x37d   :  { %1670 = vmatprep.subr.mxu1 %v1947_v35 }
 0x37e   :  { %1671 = vmatpush3.msra.mxu1 %v1947_v35 }
 0x37f   :  { %1672 = vmatprep.subr.mxu1 %v1954_v36 }
 0x380   :  { %1673 = vmatpush3.msra.mxu1 %v1954_v36 }
 0x381   :  { %1674 = vmatprep.subr.mxu1 %v1961_v37 }
 0x382   :  { %1675 = vmatpush3.msra.mxu1 %v1961_v37 }
 0x383   :  { %1676 = vmatprep.subr.mxu1 %v2023_v53 }
 0x384   :  { %1677 = vmatpush3.msra.mxu1 %v2023_v53 }
 0x385   :  { %1678 = vmatprep.subr.mxu1 %v2031_v54 }
 0x386   :  { %1679 = vmatpush3.msra.mxu1 %v2031_v54 }
 0x387   :  { %1680 = vmatprep.subr.mxu1 %v2040_v55 }
 0x388   :  { %1681 = vmatpush3.msra.mxu1 %v2040_v55 }
 0x429   :  { %v1568_v47 = vpop.f32.mrf.mxu1 }
 0x42b   :  { %v704_v12 = vpop.f32.mrf.mxu1 }
 0x42d   :  { %v1571_v48 = vpop.f32.mrf.mxu1 }
 0x42f   :  { %v714_v49 = vpop.f32.mrf.mxu1 }
 0x431   :  { %v1574_v50 = vpop.f32.mrf.mxu1 }
 0x433   :  { %v724_v51 = vpop.f32.mrf.mxu1 }
 0x435   :  { %v1577_v14 = vpop.f32.mrf.mxu1 }
 0x436   :  { %1578 = vmatprep.subr.mxu0 %v1577_v14 }
 0x437   :  { %v734_v52 = vpop.f32.mrf.mxu1  ;;  %1579 = vmatpush3.msra.mxu0 %v1577_v14 }
 0x438   :  { %1580 = vmatprep.subr.mxu0 %v734_v52 }
 0x439   :  { %1581 = vmatpush3.msra.mxu0 %v734_v52 }
 0x43a   :  { %1582 = vmatprep.subr.mxu0 %v1574_v50 }
 0x43b   :  { %1583 = vmatpush3.msra.mxu0 %v1574_v50 }
 0x43c   :  { %1584 = vmatprep.subr.mxu0 %v724_v51 }
 0x43d   :  { %1585 = vmatpush3.msra.mxu0 %v724_v51 }
 0x43e   :  { %1586 = vmatprep.subr.mxu0 %v1571_v48 }
 0x43f   :  { %1587 = vmatpush3.msra.mxu0 %v1571_v48 }
 0x440   :  { %1588 = vmatprep.subr.mxu0 %v714_v49 }
 0x441   :  { %1589 = vmatpush3.msra.mxu0 %v714_v49 }
 0x442   :  { %1590 = vmatprep.subr.mxu0 %v1568_v47 }
 0x443   :  { %1591 = vmatpush3.msra.mxu0 %v1568_v47 }
 0x444   :  { %1592 = vmatprep.subr.mxu0 %v704_v12 }
 0x445   :  { %1593 = vmatpush3.msra.mxu0 %v704_v12 }
 0x446   :  { %1595 = vmatmul.mubr.msk.f32.vlgmr.msra.gmra.mxu0 %vm201_vm0, %v630_v56  ;;  %1606 = vmatprep.subr.mxu0 %v1878_v25 }
 0x447   :  { %1597 = vmatprep.mubr.msk.f32.mxu0 %vm201_vm0, %v631_v57  ;;  %1607 = vmatpush3.msra.mxu0 %v1878_v25  ;;  %v635_v25 = vld [vmem:[%s2419_s8 + $0x30] sm:$0xff]  ;;  %v879_v57 = vld [vmem:[%s2421_s10 + $0x8] sm:$0xff] }
 0x448   :  { %1608 = vmatprep.subr.mxu0 %v1884_v26 }
 0x449   :  { %1609 = vmatpush3.msra.mxu0 %v1884_v26  ;;  %v636_v26 = vld [vmem:[%s2419_s8 + $0x38] sm:$0xff] }
 0x44a   :  { %1598 = vmatmul.mubr.msk.f32.gmra.mxu0 %vm201_vm0, %v632_v58  ;;  %1610 = vmatprep.subr.mxu0 %v1891_v27 }
 0x44b   :  { %1600 = vmatprep.mubr.msk.f32.mxu0 %vm201_vm0, %v633_v59  ;;  %1611 = vmatpush3.msra.mxu0 %v1891_v27 }
 0x44c   :  { %1612 = vmatprep.subr.mxu0 %v1898_v28 }
 0x44d   :  { %1613 = vmatpush3.msra.mxu0 %v1898_v28  ;;  %v1189_v28 = vld [vmem:[%s2420_s9] ss:$0 sm:$0xff] }
 0x44e   :  { %1601 = vmatmul.mubr.msk.f32.gmra.mxu0 %vm201_vm0, %v634_v60  ;;  %1614 = vmatprep.subr.mxu0 %v1905_v29  ;;  %v887_v60 = vld [vmem:[%s2422_s11 + $0x8] sm:$0xff] }
 0x44f   :  { %1603 = vmatprep.mubr.msk.f32.mxu0 %vm201_vm0, %v635_v25  ;;  %1615 = vmatpush3.msra.mxu0 %v1905_v29  ;;  %v878_v25 = vld [vmem:[%s2421_s10] sm:$0xff] }
 0x450   :  { %1616 = vmatprep.subr.mxu0 %v1912_v30 }
 0x451   :  { %1617 = vmatpush3.msra.mxu0 %v1912_v30 }
 0x452   :  { %1604 = vmatmul.mubr.msk.f32.gmra.mxu0 %vm201_vm0, %v636_v26  ;;  %1618 = vmatprep.subr.mxu0 %v1919_v31 }
 0x453   :  { %1619 = vmatpush3.msra.mxu0 %v1919_v31 }
 0x454   :  { %1620 = vmatprep.subr.mxu0 %v1926_v32 }
 0x455   :  { %1621 = vmatpush3.msra.mxu0 %v1926_v32 }
 0x456   :  { %1622 = vmatprep.subr.mxu0 %v1933_v33 }
 0x457   :  { %1623 = vmatpush3.msra.mxu0 %v1933_v33 }
 0x458   :  { %1624 = vmatprep.subr.mxu0 %v1940_v34 }
 0x459   :  { %1625 = vmatpush3.msra.mxu0 %v1940_v34 }
 0x45a   :  { %1626 = vmatprep.subr.mxu0 %v1947_v35 }
 0x45b   :  { %1627 = vmatpush3.msra.mxu0 %v1947_v35 }
 0x45c   :  { %1628 = vmatprep.subr.mxu0 %v1954_v36 }
 0x45d   :  { %1629 = vmatpush3.msra.mxu0 %v1954_v36 }
 0x45e   :  { %1630 = vmatprep.subr.mxu0 %v1961_v37 }
 0x45f   :  { %1631 = vmatpush3.msra.mxu0 %v1961_v37 }
 0x460   :  { %1632 = vmatprep.subr.mxu0 %v2023_v53 }
 0x461   :  { %1633 = vmatpush3.msra.mxu0 %v2023_v53 }
 0x462   :  { %1634 = vmatprep.subr.mxu0 %v2031_v54 }
 0x463   :  { %1635 = vmatpush3.msra.mxu0 %v2031_v54 }
 0x464   :  { %1636 = vmatprep.subr.mxu0 %v2040_v55 }
 0x465   :  { %1637 = vmatpush3.msra.mxu0 %v2040_v55 }
 0x506   :  { %v1596_v27 = vpop.f32.mrf.mxu0 }
 0x507   :  { %v845_v31 = vadd.f32 %v1596_v27, %v1189_v28 }
 0x508   :  { %v839_v29 = vpop.f32.mrf.mxu0 }
 0x509   :  { %v840_v30 = vadd.f32 %v1189_v28, %v839_v29  ;;  %v886_v29 = vld [vmem:[%s2422_s11] sm:$0xff] }
 0x50a   :  { %v1599_v32 = vpop.f32.mrf.mxu0 }
 0x50b   :  { %1638 = vmatprep.mubr.f32.mxu0 %v840_v30  ;;  %v855_v35 = vadd.f32 %v1599_v32, %v1189_v28 }
 0x50c   :  { %v849_v33 = vpop.f32.mrf.mxu0  ;;  %1639 = vmatmul.mubr.f32.vlgmr.msra.gmra.mxu0 %v845_v31 }
 0x50d   :  { %v850_v34 = vadd.f32 %v1189_v28, %v849_v33 }
 0x50e   :  { %v1602_v36 = vpop.f32.mrf.mxu0 }
 0x50f   :  { %1641 = vmatprep.mubr.f32.mxu0 %v850_v34  ;;  %v865_v54 = vadd.f32 %v1602_v36, %v1189_v28  ;;  %v880_v36 = vld [vmem:[%s2421_s10 + $0x10] sm:$0xff] }
 0x510   :  { %v859_v37 = vpop.f32.mrf.mxu0  ;;  %1642 = vmatmul.mubr.f32.gmra.mxu0 %v855_v35 }
 0x511   :  { %v860_v53 = vadd.f32 %v1189_v28, %v859_v37 }
 0x512   :  { %v1605_v55 = vpop.f32.mrf.mxu0 }
 0x513   :  { %1644 = vmatprep.mubr.f32.mxu0 %v860_v53  ;;  %v875_v62 = vadd.f32 %v1605_v55, %v1189_v28 }
 0x514   :  { %v869_v18 = vpop.f32.mrf.mxu0  ;;  %1645 = vmatmul.mubr.f32.gmra.mxu0 %v865_v54 }
 0x515   :  { %v870_v61 = vadd.f32 %v1189_v28, %v869_v18 }
 0x517   :  { %1647 = vmatprep.mubr.f32.mxu0 %v870_v61 }
 0x518   :  { %1648 = vmatmul.mubr.f32.gmra.mxu0 %v875_v62 }
 0x5cc   :  { %v1640_v63 = vpop.f32.mrf.mxu0 }
 0x5cd   :  { %v1000_v0 = vsub.f32 %v845_v31, %v1640_v63 }
 0x5ce   :  { %v960_v20 = vpop.f32.mrf.mxu0 }
 0x5cf   :  { %v999_v1 = vsub.f32 %v840_v30, %v960_v20  ;;  %v1008_v4 = vmul.f32 %v1000_v0, %v1000_v0  ;;  %v881_v30 = vld [vmem:[%s2421_s10 + $0x18] sm:$0xff] }
 0x5d0   :  { %v1643_v2 = vpop.f32.mrf.mxu0 }
 0x5d1   :  { %v1007_v3 = vmul.f32 %v999_v1, %v999_v1  ;;  %v2285_v5 = vsub.f32 %v855_v35, %v1643_v2  ;;  %v889_v35 = vld [vmem:[%s2422_s11 + $0x18] sm:$0xff]  ;;  %v883_v2 = vld [vmem:[%s2421_s10 + $0x28] sm:$0xff] }
 0x5d2   :  { %v970_v6 = vpop.f32.mrf.mxu0 }
 0x5d3   :  { %v2287_v7 = vsub.f32 %v850_v34, %v970_v6  ;;  %1682 = vmatprep.mubr.f32.mxu1 %v1007_v3  ;;  %v1010_v9 = vmul.f32 %v2285_v5, %v2285_v5  ;;  %v1727_v6 = vld [vmem:[%s2412_s0] sm:$0xff] }
 0x5d4   :  { %v1646_v24 = vpop.f32.mrf.mxu0  ;;  %1683 = vmatmul.mubr.f32.vlgmr.msra.gmra.mxu1 %v1008_v4 }
 0x5d5   :  { %v1009_v8 = vmul.f32 %v2287_v7, %v2287_v7  ;;  %v2293_v10 = vsub.f32 %v865_v54, %v1646_v24 }
 0x5d6   :  { %v980_v11 = vpop.f32.mrf.mxu0 }
 0x5d7   :  { %v2295_v39 = vsub.f32 %v860_v53, %v980_v11  ;;  %1685 = vmatprep.mubr.f32.mxu1 %v1009_v8  ;;  %v1012_v16 = vmul.f32 %v2293_v10, %v2293_v10 }
 0x5d8   :  { %v1649_v13 = vpop.f32.mrf.mxu0  ;;  %1686 = vmatmul.mubr.f32.gmra.mxu1 %v1010_v9  ;;  %v891_v9 = vld [vmem:[%s2422_s11 + $0x28] sm:$0xff] }
 0x5d9   :  { %v1011_v15 = vmul.f32 %v2295_v39, %v2295_v39  ;;  %v2301_v17 = vsub.f32 %v875_v62, %v1649_v13  ;;  %v1726_v62 = vld [vmem:[%s2412_s0 + $0x8] sm:$0xff] }
 0x5da   :  { %v990_v19 = vpop.f32.mrf.mxu0 }
 0x5db   :  { %v2303_v21 = vsub.f32 %v870_v61, %v990_v19  ;;  %1688 = vmatprep.mubr.f32.mxu1 %v1011_v15  ;;  %v1014_v22 = vmul.f32 %v2301_v17, %v2301_v17  ;;  %v888_v61 = vld [vmem:[%s2422_s11 + $0x10] sm:$0xff]  ;;  %v890_v15 = vld [vmem:[%s2422_s11 + $0x20] sm:$0xff]  ;;  %v1728_v19 = vld [vmem:[%s2412_s0 + $0x18] sm:$0xff] }
 0x5dc   :  { %1689 = vmatmul.mubr.f32.gmra.mxu1 %v1012_v16  ;;  %v885_v16 = vld [vmem:[%s2421_s10 + $0x38] sm:$0xff] }
 0x5dd   :  { %v1013_v43 = vmul.f32 %v2303_v21, %v2303_v21 }
 0x5df   :  { %1691 = vmatprep.mubr.f32.mxu1 %v1013_v43 }
 0x5e0   :  { %1692 = vmatmul.mubr.f32.gmra.mxu1 %v1014_v22 }
 0x694   :  { %v1684_v23 = vpop.f32.mrf.mxu1 }
 0x695   :  { %v1087_v38 = vadd.f32 1e-05, %v1684_v23 }
 0x696   :  { %v1081_v40 = vpop.f32.mrf.mxu1 }
 0x697   :  { %1710 = vrsqrt.f32 %v1087_v38  ;;  %v1082_v45 = vadd.f32 1e-05, %v1081_v40 }
 0x698   :  { %v1687_v41 = vpop.f32.mrf.mxu1 }
 0x699   :  { %1712 = vrsqrt.f32 %v1082_v45  ;;  %v1097_v42 = vadd.f32 1e-05, %v1687_v41  ;;  %v893_v45 = vld [vmem:[%s2422_s11 + $0x38] sm:$0xff]  ;;  %v884_v41 = vld [vmem:[%s2421_s10 + $0x30] sm:$0xff] }
 0x69a   :  { %v1091_v44 = vpop.f32.mrf.mxu1 }
 0x69b   :  { %1714 = vrsqrt.f32 %v1097_v42  ;;  %v1092_v46 = vadd.f32 1e-05, %v1091_v44  ;;  %v1729_v42 = vld [vmem:[%s2412_s0 + $0x10] sm:$0xff] }
 0x69c   :  { %v1690_v47 = vpop.f32.mrf.mxu1 }
 0x69d   :  { %1716 = vrsqrt.f32 %v1092_v46  ;;  %v1107_v12 = vadd.f32 1e-05, %v1690_v47 }
 0x69e   :  { %v1101_v48 = vpop.f32.mrf.mxu1 }
 0x69f   :  { %1718 = vrsqrt.f32 %v1107_v12  ;;  %v1102_v49 = vadd.f32 1e-05, %v1101_v48  ;;  %v892_v48 = vld [vmem:[%s2422_s11 + $0x30] sm:$0xff] }
 0x6a0   :  { %v1693_v50 = vpop.f32.mrf.mxu1 }
 0x6a1   :  { %1720 = vrsqrt.f32 %v1102_v49  ;;  %v1117_v51 = vadd.f32 1e-05, %v1693_v50 }
 0x6a2   :  { %v1111_v14 = vpop.f32.mrf.mxu1 }
 0x6a3   :  { %1722 = vrsqrt.f32 %v1117_v51  ;;  %v1112_v52 = vadd.f32 1e-05, %v1111_v14  ;;  %v1730_v14 = vld [vmem:[%s2412_s0 + $0x28] sm:$0xff] }
 0x6a4   :  { %v1711_v56 = vpop.eup %1710 }
 0x6a5   :  { %v1129_v58 = vmul.f32 %v1711_v56, %v1000_v0  ;;  %1724 = vrsqrt.f32 %v1112_v52 }
 0x6a6   :  { %v1713_v59 = vpop.eup %1712 }
 0x6a7   :  { %v1137_v26 = vmul.f32 %v1129_v58, %v879_v57  ;;  %v1128_v27 = vmul.f32 %v1713_v59, %v999_v1  ;;  %v1732_v59 = vld [vmem:[%s2412_s0 + $0x38] sm:$0xff] }
 0x6a8   :  { %v1715_v28 = vpop.eup %1714 }
 0x6a9   :  { %v1145_v31 = vadd.f32 %v1137_v26, %v887_v60  ;;  %v1136_v32 = vmul.f32 %v1128_v27, %v878_v25  ;;  %v1131_v33 = vmul.f32 %v1715_v28, %v2285_v5  ;;  %v882_v5 = vld [vmem:[%s2421_s10 + $0x20] sm:$0xff]  ;;  %v1733_v26 = vld [vmem:[%s2412_s0 + $0x30] sm:$0xff] }
 0x6aa   :  { %v1717_v34 = vpop.eup %1716 }
 0x6ab   :  { %v1153_v37 = vmax.f32 %v1145_v31, 0.0  ;;  %v1144_v53 = vadd.f32 %v1136_v32, %v886_v29  ;;  %v1139_v54 = vmul.f32 %v1131_v33, %v881_v30  ;;  %v1130_v55 = vmul.f32 %v1717_v34, %v2287_v7 }
 0x6ac   :  { %v1719_v18 = vpop.eup %1718 }
 0x6ad   :  { %v1161_v63 = vadd.f32 %v1726_v62, %v1153_v37  ;;  %v1152_v0 = vmax.f32 %v1144_v53, 0.0  ;;  %v1147_v20 = vadd.f32 %v1139_v54, %v889_v35  ;;  %v1138_v1 = vmul.f32 %v1130_v55, %v880_v36 }
 0x6ae   :  { %v1721_v3 = vpop.eup %1720  ;;  %v1133_v4 = vmul.f32 %v1719_v18, %v2293_v10 }
 0x6af   :  { %1169 = vst [vmem:[%s2423_s12 + $0x8] sm:$0xff] %v1161_v63  ;;  %v1160_v7 = vadd.f32 %v1727_v6, %v1152_v0  ;;  %v1155_v24 = vmax.f32 %v1147_v20, 0.0  ;;  %v1146_v8 = vadd.f32 %v1138_v1, %v888_v61  ;;  %v1132_v10 = vmul.f32 %v1721_v3, %v2295_v39 }
 0x6b0   :  { %v1723_v11 = vpop.eup %1722  ;;  %v1141_v13 = vmul.f32 %v1133_v4, %v883_v2 }
 0x6b1   :  { %1168 = vst [vmem:[%s2423_s12] sm:$0xff] %v1160_v7  ;;  %v1163_v43 = vadd.f32 %v1728_v19, %v1155_v24  ;;  %v1154_v39 = vmax.f32 %v1146_v8, 0.0  ;;  %v1140_v22 = vmul.f32 %v1132_v10, %v882_v5  ;;  %v1135_v23 = vmul.f32 %v1723_v11, %v2301_v17 }
 0x6b2   :  { %v1725_v38 = vpop.eup %1724  ;;  %v1149_v40 = vadd.f32 %v1141_v13, %v891_v9 }
 0x6b3   :  { %1171 = vst [vmem:[%s2423_s12 + $0x18] sm:$0xff] %v1163_v43  ;;  %v1162_v44 = vadd.f32 %v1729_v42, %v1154_v39  ;;  %v1148_v17 = vadd.f32 %v1140_v22, %v890_v15  ;;  %v1143_v46 = vmul.f32 %v1135_v23, %v885_v16  ;;  %v1134_v47 = vmul.f32 %v1725_v38, %v2303_v21  ;;  %v1731_v21 = vld [vmem:[%s2412_s0 + $0x20] sm:$0xff] }
 0x6b4   :  { %v1157_v12 = vmax.f32 %v1149_v40, 0.0 }
 0x6b5   :  { %1170 = vst [vmem:[%s2423_s12 + $0x10] sm:$0xff] %v1162_v44  ;;  %v1156_v49 = vmax.f32 %v1148_v17, 0.0  ;;  %v1151_v50 = vadd.f32 %v1143_v46, %v893_v45  ;;  %v1142_v51 = vmul.f32 %v1134_v47, %v884_v41 }
 0x6b6   :  { %v1165_v52 = vadd.f32 %v1730_v14, %v1157_v12 }
 0x6b7   :  { %v1164_v56 = vadd.f32 %v1731_v21, %v1156_v49  ;;  %v1159_v57 = vmax.f32 %v1151_v50, 0.0  ;;  %v1150_v58 = vadd.f32 %v1142_v51, %v892_v48 }
 0x6b8   :  { %1173 = vst [vmem:[%s2423_s12 + $0x28] sm:$0xff] %v1165_v52 }
 0x6b9   :  { %1172 = vst [vmem:[%s2423_s12 + $0x20] sm:$0xff] %v1164_v56  ;;  %v1167_v60 = vadd.f32 %v1732_v59, %v1159_v57  ;;  %v1158_v25 = vmax.f32 %v1150_v58, 0.0 }
 0x6bb   :  { %1175 = vst [vmem:[%s2423_s12 + $0x38] sm:$0xff] %v1167_v60  ;;  %v1166_v27 = vadd.f32 %v1733_v26, %v1158_v25 }
 0x6bd   :  { %1174 = vst [vmem:[%s2423_s12 + $0x30] sm:$0xff] %v1166_v27 }

</bundles_post_ra>
